<compile_context>
chip_gen: v7x
topology: tpu7x:2x2x1
jax: 0.10.0
libtpu: 0.0.40
codegen_flags: <defaults>
</compile_context>

<pallas_src>
import jax
import jax.numpy as jnp
from jax.experimental import pallas as pl
from jax.experimental.pallas import tpu as pltpu


# ------------------- pass 1 (tiled): pooled, folded K_T / V' -------------------
# x_ref   : (1, 4, TM, C) f32   the 4 subgrid row-blocks of one pooled-row tile
# wpg_ref : (C, C8+C2)    bf16  fused [w_phi | w_g]
# wt_ref  : (C, C8)       bf16  theta (folded into K)
# wo_ref  : (C2, C)       bf16  output projection (folded into V)
# kt_ref  : (1, C, TM)    bf16  K_T tile (keys pre-multiplied by theta, transposed)
# vp_ref  : (1, TM, C)    bf16  V' tile (values pre-multiplied by wo) -- lane-dense
def _kv_kernel(x_ref, wpg_ref, wt_ref, wo_ref, kt_ref, vp_ref):
    wpg = wpg_ref[...]
    c8 = wt_ref.shape[1]
    # 2x2 max-pool as a running max over the 4 per-subgrid projections (pointwise
    # conv commutes with the per-pixel max; subgrid-major layout makes the 4 shifted
    # grids contiguous, sublane-aligned row blocks).  Same MXU work, 4x smaller
    # live f32 intermediate than one (4*TM, C8+C2) matmul.
    pooled = jnp.dot(x_ref[0, 0].astype(jnp.bfloat16), wpg,
                     preferred_element_type=jnp.float32)
    for d in range(1, 4):
        pooled = jnp.maximum(
            pooled,
            jnp.dot(x_ref[0, d].astype(jnp.bfloat16), wpg,
                    preferred_element_type=jnp.float32))
    g = pooled[:, :c8].astype(jnp.bfloat16)       # (TM, C8)  pooled phi
    h = pooled[:, c8:].astype(jnp.bfloat16)       # (TM, C2)  pooled g-branch
    # Fold theta into the keys:  K_T[c, m] = sum_j wt[c, j] * g[m, j]   -> (C, TM)
    kt_ref[0] = jax.lax.dot_general(
        wt_ref[...], g, (((1,), (1,)), ((), ())),
        preferred_element_type=jnp.float32).astype(jnp.bfloat16)
    # Fold the output projection into the values:  V' = h @ wo          -> (TM, C)
    vp_ref[0] = jnp.dot(h, wo_ref[...],
                        preferred_element_type=jnp.float32).astype(jnp.bfloat16)


# ---------------------- pass 2: query-tiled attention ----------------------
# x_ref : (1, TQ, C)  f32  query tile (also the residual)
# kt_ref: (1, C, M)   bf16 folded keys (transposed)   vp_ref: (1, M, C) bf16 folded values
# gamma_ref : (1,) f32 in SMEM (scalar path)
# o_ref : (1, TQ, C)  f32  lane-dense output tile (aliased onto x_sub in HBM)
def _attn_kernel(x_ref, kt_ref, vp_ref, gamma_ref, o_ref):
    xq = x_ref[0]                                                          # (TQ, C) f32
    # scores with a full C-deep MXU contraction (no 16-wide operands anywhere)
    s = jnp.dot(xq.astype(jnp.bfloat16), kt_ref[0],
                preferred_element_type=jnp.float32)                        # (TQ, M) f32
    # softmax kept in f32; normalization deferred past the value matmul.
    s = s - jnp.max(s, axis=-1, keepdims=True)
    p = jnp.exp(s)
    denom = jnp.sum(p, axis=-1, keepdims=True)                             # (TQ, 1)
    out = jnp.dot(p.astype(jnp.bfloat16), vp_ref[0],
                  preferred_element_type=jnp.float32)                      # (TQ, C)
    # fold 1/rowsum (EUP reciprocal) into the gamma epilogue; residual stays exact f32.
    scale = gamma_ref[0] * pl.reciprocal(denom, approx=True)               # (TQ, 1)
    o_ref[0] = out * scale + xq


# -------------- fused single-launch path for small feature maps --------------
# One grid step per batch: x is read from HBM exactly once, K_T/V' live only in
# registers/VMEM, no second kernel launch.  Only used when HW is small.
# x_ref: (1, HW, C) f32   o_ref: (1, HW, C) f32 (aliased onto x_sub)
def _fused_kernel(x_ref, wpg_ref, wt_ref, wo_ref, gamma_ref, o_ref):
    x = x_ref[0]                                                           # (HW, C) f32
    x_bf = x.astype(jnp.bfloat16)
    hw = x.shape[0]
    m = hw // 4
    c8 = wt_ref.shape[1]
    wpg = wpg_ref[...]
    pooled = jnp.dot(x_bf[0:m], wpg, preferred_element_type=jnp.float32)
    for d in range(1, 4):
        pooled = jnp.maximum(
            pooled,
            jnp.dot(x_bf[d * m:(d + 1) * m], wpg,
                    preferred_element_type=jnp.float32))
    g = pooled[:, :c8].astype(jnp.bfloat16)                                # (M, C8)
    h = pooled[:, c8:].astype(jnp.bfloat16)                                # (M, C2)
    kt = jax.lax.dot_general(wt_ref[...], g, (((1,), (1,)), ((), ())),
                             preferred_element_type=jnp.float32).astype(jnp.bfloat16)
    vp = jnp.dot(h, wo_ref[...],
                 preferred_element_type=jnp.float32).astype(jnp.bfloat16)  # (M, C)
    s = jnp.dot(x_bf, kt, preferred_element_type=jnp.float32)              # (HW, M)
    s = s - jnp.max(s, axis=-1, keepdims=True)
    p = jnp.exp(s)
    denom = jnp.sum(p, axis=-1, keepdims=True)
    out = jnp.dot(p.astype(jnp.bfloat16), vp, preferred_element_type=jnp.float32)
    scale = gamma_ref[0] * pl.reciprocal(denom, approx=True)
    o_ref[0] = out * scale + x


def pooled_self_attention_2d(x_nchw, params, *, tq=256, tm=128):
    """Forward pass matching PooledSelfAttention2d. x_nchw: (B, C, H, W) float32."""
    wt, wp, wg, wo, gamma = params
    B, C, H, W = x_nchw.shape
    assert C % 8 == 0 and H % 2 == 0 and W % 2 == 0
    C8, C2 = C // 8, C // 2
    HW = H * W
    M = HW // 4
    if HW % tq != 0:
        tq = HW
    # K_T output block has TM as its last (lane) dim -> TM must be a multiple of 128
    # or equal to the full pooled extent M.
    if M % tm != 0 or tm % 128 != 0:
        tm = M

    # ---- glue: layout plumbing only (single copy of x in HBM) ----
    # Subgrid-major row order: n' = (dh*2+dw)*(HW/4) + h2*(W/2) + w2 for pixel
    # (2*h2+dh, 2*w2+dw).  Attention is invariant to query/key row permutations and
    # the permutation is inverted on the output below.
    x_nhwc = jnp.transpose(x_nchw, (0, 2, 3, 1))                           # (B, H, W, C)
    x_sub = jnp.transpose(x_nhwc.reshape(B, H // 2, 2, W // 2, 2, C),
                          (0, 2, 4, 1, 3, 5)).reshape(B, HW, C)

    wpg_b = jnp.concatenate([wp, wg], axis=1).astype(jnp.bfloat16)          # (C, C8+C2)
    wt_b = wt.astype(jnp.bfloat16)                                          # (C, C8)
    wo_b = wo.astype(jnp.bfloat16)                                          # (C2, C)

    vmem_limit = 32 * 1024 * 1024   # explicit: > v5e's 16 MiB default, < v7x's budget

    use_fused = HW <= 512   # whole-map attention fits trivially in VMEM

    if use_fused:
        out_sub = pl.pallas_call(
            _fused_kernel,
            out_shape=jax.ShapeDtypeStruct((B, HW, C), jnp.float32),
            grid_spec=pltpu.PrefetchScalarGridSpec(
                num_scalar_prefetch=0,
                grid=(B,),
                in_specs=[
                    pl.BlockSpec((1, HW, C), lambda b: (b, 0, 0)),
                    pl.BlockSpec((C, C8 + C2), lambda b: (0, 0)),
                    pl.BlockSpec((C, C8), lambda b: (0, 0)),
                    pl.BlockSpec((C2, C), lambda b: (0, 0)),
                    pl.BlockSpec(memory_space=pltpu.MemorySpace.SMEM),  # gamma
                ],
                out_specs=pl.BlockSpec((1, HW, C), lambda b: (b, 0, 0)),
            ),
            input_output_aliases={0: 0},    # write the result in place of x_sub
            compiler_params=pltpu.CompilerParams(
                dimension_semantics=("parallel",),
                vmem_limit_bytes=vmem_limit),
        )(x_sub, wpg_b, wt_b, wo_b, gamma)
    else:
        # ---- pass 1: pooled-row-tiled fused [phi|g] projection + pool + folds ----
        x_sub4 = x_sub.reshape(B, 4, M, C)   # free reshape of the subgrid-major layout
        kt, vp = pl.pallas_call(
            _kv_kernel,
            out_shape=(jax.ShapeDtypeStruct((B, C, M), jnp.bfloat16),
                       jax.ShapeDtypeStruct((B, M, C), jnp.bfloat16)),
            grid_spec=pltpu.PrefetchScalarGridSpec(
                num_scalar_prefetch=0,
                grid=(B, M // tm),
                in_specs=[
                    pl.BlockSpec((1, 4, tm, C), lambda b, t: (b, 0, t, 0)),
                    pl.BlockSpec((C, C8 + C2), lambda b, t: (0, 0)),
                    pl.BlockSpec((C, C8), lambda b, t: (0, 0)),
                    pl.BlockSpec((C2, C), lambda b, t: (0, 0)),
                ],
                out_specs=[
                    pl.BlockSpec((1, C, tm), lambda b, t: (b, 0, t)),
                    pl.BlockSpec((1, tm, C), lambda b, t: (b, t, 0)),
                ],
            ),
            compiler_params=pltpu.CompilerParams(
                dimension_semantics=("parallel", "parallel"),
                vmem_limit_bytes=vmem_limit),
        )(x_sub4, wpg_b, wt_b, wo_b)

        # ---- pass 2: query-tiled attention + gamma residual (2 matmuls/tile) ----
        # TODO(synk): on v5e consider pipeline_mode=pl.Buffered(3) on the x tile spec
        # if the f32 tile DMA shows up as exposed latency.
        out_sub = pl.pallas_call(
            _attn_kernel,
            out_shape=jax.ShapeDtypeStruct((B, HW, C), jnp.float32),
            grid_spec=pltpu.PrefetchScalarGridSpec(
                num_scalar_prefetch=0,
                grid=(B, HW // tq),
                in_specs=[
                    pl.BlockSpec((1, tq, C), lambda b, q: (b, q, 0)),
                    pl.BlockSpec((1, C, M), lambda b, q: (b, 0, 0)),
                    pl.BlockSpec((1, M, C), lambda b, q: (b, 0, 0)),
                    pl.BlockSpec(memory_space=pltpu.MemorySpace.SMEM),  # gamma
                ],
                out_specs=pl.BlockSpec((1, tq, C), lambda b, q: (b, q, 0)),
            ),
            input_output_aliases={0: 0},    # write the result in place of x_sub
            compiler_params=pltpu.CompilerParams(
                dimension_semantics=("parallel", "parallel"),
                vmem_limit_bytes=vmem_limit),
        )(x_sub, kt, vp, gamma)

    # ---- glue: invert the row permutation, back to NCHW ----
    o = jnp.transpose(out_sub.reshape(B, 2, 2, H // 2, W // 2, C),
                      (0, 3, 1, 4, 2, 5)).reshape(B, H, W, C)
    return jnp.transpose(o, (0, 3, 1, 2))


# ---------------- parameter setup (deterministic, synthetic) ----------------

def _spectral_normalize(w, iters=50):
    """Divide a (n_out, n_in) matrix by its top singular value (spectral_norm)."""
    v = jnp.ones((w.shape[1],), jnp.float32)

    def body(_, v):
        u = w @ v
        u = u / (jnp.linalg.norm(u) + 1e-12)
        v = w.T @ u
        v = v / (jnp.linalg.norm(v) + 1e-12)
        return v

    v = jax.lax.fori_loop(0, iters, body, v)
    sigma = jnp.linalg.norm(w @ v) + 1e-12
    return w / sigma


def init_params(key, C):
    C8, C2 = C // 8, C // 2
    k1, k2, k3, k4 = jax.random.split(key, 4)

    def conv_w(k, n_out, n_in):
        w = jax.random.normal(k, (n_out, n_in), jnp.float32) / jnp.sqrt(n_in)
        w = _spectral_normalize(w)          # NormType.Spectral on the 1x1 conv
        return w.T                          # stored (n_in, n_out): right-multiplied

    wt = conv_w(k1, C8, C)                  # theta: C -> C//8
    wp = conv_w(k2, C8, C)                  # phi:   C -> C//8
    wg = conv_w(k3, C2, C)                  # g:     C -> C//2
    wo = conv_w(k4, C, C2)                  # o:     C//2 -> C
    # nn.Parameter(tensor([0.])) in the module; use 0.5 so the attention path is
    # actually exercised numerically (gamma=0 would make output == x).
    gamma = jnp.full((1,), 0.5, jnp.float32)
    return wt, wp, wg, wo, gamma


# ---------------- pure-JAX reference (for correctness check) ----------------

def reference(x_nchw, params):
    wt, wp, wg, wo, gamma = params
    B, C, H, W = x_nchw.shape
    C8, C2 = C // 8, C // 2
    x_nhwc = jnp.transpose(x_nchw, (0, 2, 3, 1))

    def conv1x1(x, w):
        return jnp.einsum("bhwc,cd->bhwd", x, w)

    def maxpool2(x):
        B_, H_, W_, C_ = x.shape
        return x.reshape(B_, H_ // 2, 2, W_ // 2, 2, C_).max(axis=(2, 4))

    f = conv1x1(x_nhwc, wt).reshape(B, H * W, C8)
    g = maxpool2(conv1x1(x_nhwc, wp)).reshape(B, H * W // 4, C8)
    h = maxpool2(conv1x1(x_nhwc, wg)).reshape(B, H * W // 4, C2)
    beta = jax.nn.softmax(jnp.einsum("bnc,bmc->bnm", f, g), axis=-1)
    o_inner = jnp.einsum("bnm,bmc->bnc", beta, h)
    o = jnp.einsum("bnc,cd->bnd", o_inner, wo)
    y = gamma[0] * o + x_nhwc.reshape(B, H * W, C)
    return jnp.transpose(y.reshape(B, H, W, C), (0, 3, 1, 2))


if __name__ == "__main__":
    key = jax.random.PRNGKey(0)
    kx1, kx2, kp = jax.random.split(key, 3)
    # C=128 keeps the x / output blocks lane-dense; n_channels must be divisible by 8.
    B, C = 2, 128
    params = init_params(kp, C)
    fwd = jax.jit(pooled_self_attention_2d)

    # Test 1: small feature map (H=W=16, HW=256) -> fused single-launch path.
    x1 = jax.random.normal(kx1, (B, C, 16, 16), jnp.float32)
    y1 = jax.block_until_ready(fwd(x1, params))
    y1_ref = reference(x1, params)
    assert y1.shape == x1.shape
    err1 = float(jnp.max(jnp.abs(y1 - y1_ref)))
    assert jnp.allclose(y1, y1_ref, atol=2e-2, rtol=2e-2), err1

    # Test 2: larger feature map (H=W=32, HW=1024) -> tiled two-pass path
    # (pass 1 tiled over pooled rows, pass 2 over TQ=256 query tiles).
    x2 = jax.random.normal(kx2, (B, C, 32, 32), jnp.float32)
    y2 = jax.block_until_ready(fwd(x2, params))
    y2_ref = reference(x2, params)
    assert y2.shape == x2.shape
    err2 = float(jnp.max(jnp.abs(y2 - y2_ref)))
    assert jnp.allclose(y2, y2_ref, atol=2e-2, rtol=2e-2), err2

    print("KERNEL_OK")
</pallas_src>

<mosaic_0001>
module attributes {stable_mosaic.version = 11 : i64} {
  func.func @_fused_kernel(%arg0: i32, %arg1: memref<1x256x128xf32, #tpu.memory_space<vmem>>, %arg2: memref<128x80xbf16, #tpu.memory_space<vmem>>, %arg3: memref<128x16xbf16, #tpu.memory_space<vmem>>, %arg4: memref<64x128xbf16, #tpu.memory_space<vmem>>, %arg5: memref<1xf32, #tpu.memory_space<smem>>, %arg6: memref<1x256x128xf32, #tpu.memory_space<vmem>>) attributes {dimension_semantics = [#tpu.dimension_semantics<parallel>], iteration_bounds = array<i64: 2>, scalar_prefetch = 0 : i64, scratch_operands = 0 : i64, tpu.core_type = #tpu.core_type<tc>, window_params = [{transform_indices = @transform_0, window_bounds = array<i64: 1, 256, 128>}, {pipeline_mode = #tpu.pipeline_mode<synchronous>, transform_indices = @transform_1, window_bounds = array<i64: 128, 80>}, {pipeline_mode = #tpu.pipeline_mode<synchronous>, transform_indices = @transform_2, window_bounds = array<i64: 128, 16>}, {pipeline_mode = #tpu.pipeline_mode<synchronous>, transform_indices = @transform_3, window_bounds = array<i64: 64, 128>}, {transform_indices = @transform_4, window_bounds = array<i64: 1>}, {transform_indices = @transform_5, window_bounds = array<i64: 1, 256, 128>}]} {
    %c0 = arith.constant 0 : index
    %c0_0 = arith.constant 0 : index
    %c0_1 = arith.constant 0 : index
    %0 = vector.load %arg1[%c0, %c0_0, %c0_1] : memref<1x256x128xf32, #tpu.memory_space<vmem>>, vector<1x256x128xf32>
    %1 = vector.shape_cast %0 : vector<1x256x128xf32> to vector<256x128xf32>
    %2 = arith.truncf %1 : vector<256x128xf32> to vector<256x128xbf16>
    %c0_2 = arith.constant 0 : index
    %c0_3 = arith.constant 0 : index
    %3 = vector.load %arg2[%c0_2, %c0_3] : memref<128x80xbf16, #tpu.memory_space<vmem>>, vector<128x80xbf16>
    %4 = vector.extract_strided_slice %2 {offsets = [0, 0], sizes = [64, 128], strides = [1, 1]} : vector<256x128xbf16> to vector<64x128xbf16>
    %cst = arith.constant dense<0.000000e+00> : vector<64x80xf32>
    %5 = tpu.matmul %4, %3, %cst {dimension_numbers = #tpu.dot_dimension_numbers<[1], [0], [0], [1], [0, 0, 1, 1], [], []>} : vector<64x128xbf16>, vector<128x80xbf16>, vector<64x80xf32> -> vector<64x80xf32>
    %6 = vector.extract_strided_slice %2 {offsets = [64, 0], sizes = [64, 128], strides = [1, 1]} : vector<256x128xbf16> to vector<64x128xbf16>
    %cst_4 = arith.constant dense<0.000000e+00> : vector<64x80xf32>
    %7 = tpu.matmul %6, %3, %cst_4 {dimension_numbers = #tpu.dot_dimension_numbers<[1], [0], [0], [1], [0, 0, 1, 1], [], []>} : vector<64x128xbf16>, vector<128x80xbf16>, vector<64x80xf32> -> vector<64x80xf32>
    %8 = arith.maximumf %5, %7 : vector<64x80xf32>
    %9 = vector.extract_strided_slice %2 {offsets = [128, 0], sizes = [64, 128], strides = [1, 1]} : vector<256x128xbf16> to vector<64x128xbf16>
    %cst_5 = arith.constant dense<0.000000e+00> : vector<64x80xf32>
    %10 = tpu.matmul %9, %3, %cst_5 {dimension_numbers = #tpu.dot_dimension_numbers<[1], [0], [0], [1], [0, 0, 1, 1], [], []>} : vector<64x128xbf16>, vector<128x80xbf16>, vector<64x80xf32> -> vector<64x80xf32>
    %11 = arith.maximumf %8, %10 : vector<64x80xf32>
    %12 = vector.extract_strided_slice %2 {offsets = [192, 0], sizes = [64, 128], strides = [1, 1]} : vector<256x128xbf16> to vector<64x128xbf16>
    %cst_6 = arith.constant dense<0.000000e+00> : vector<64x80xf32>
    %13 = tpu.matmul %12, %3, %cst_6 {dimension_numbers = #tpu.dot_dimension_numbers<[1], [0], [0], [1], [0, 0, 1, 1], [], []>} : vector<64x128xbf16>, vector<128x80xbf16>, vector<64x80xf32> -> vector<64x80xf32>
    %14 = arith.maximumf %11, %13 : vector<64x80xf32>
    %15 = vector.extract_strided_slice %14 {offsets = [0, 0], sizes = [64, 16], strides = [1, 1]} : vector<64x80xf32> to vector<64x16xf32>
    %16 = arith.truncf %15 : vector<64x16xf32> to vector<64x16xbf16>
    %17 = vector.extract_strided_slice %14 {offsets = [0, 16], sizes = [64, 64], strides = [1, 1]} : vector<64x80xf32> to vector<64x64xf32>
    %18 = arith.truncf %17 : vector<64x64xf32> to vector<64x64xbf16>
    %c0_7 = arith.constant 0 : index
    %c0_8 = arith.constant 0 : index
    %19 = vector.load %arg3[%c0_7, %c0_8] : memref<128x16xbf16, #tpu.memory_space<vmem>>, vector<128x16xbf16>
    %cst_9 = arith.constant dense<0.000000e+00> : vector<128x64xf32>
    %20 = tpu.matmul %19, %16, %cst_9 {dimension_numbers = #tpu.dot_dimension_numbers<[1], [1], [0], [0], [0, 0, 1, 0], [], []>} : vector<128x16xbf16>, vector<64x16xbf16>, vector<128x64xf32> -> vector<128x64xf32>
    %21 = arith.truncf %20 : vector<128x64xf32> to vector<128x64xbf16>
    %c0_10 = arith.constant 0 : index
    %c0_11 = arith.constant 0 : index
    %22 = vector.load %arg4[%c0_10, %c0_11] : memref<64x128xbf16, #tpu.memory_space<vmem>>, vector<64x128xbf16>
    %cst_12 = arith.constant dense<0.000000e+00> : vector<64x128xf32>
    %23 = tpu.matmul %18, %22, %cst_12 {dimension_numbers = #tpu.dot_dimension_numbers<[1], [0], [0], [1], [0, 0, 1, 1], [], []>} : vector<64x64xbf16>, vector<64x128xbf16>, vector<64x128xf32> -> vector<64x128xf32>
    %24 = arith.truncf %23 : vector<64x128xf32> to vector<64x128xbf16>
    %cst_13 = arith.constant dense<0.000000e+00> : vector<256x64xf32>
    %25 = tpu.matmul %2, %21, %cst_13 {dimension_numbers = #tpu.dot_dimension_numbers<[1], [0], [0], [1], [0, 0, 1, 1], [], []>} : vector<256x128xbf16>, vector<128x64xbf16>, vector<256x64xf32> -> vector<256x64xf32>
    %cst_14 = arith.constant dense<0xFF800000> : vector<256xf32>
    %26 = vector.multi_reduction <maximumf>, %25, %cst_14 [1] : vector<256x64xf32> to vector<256xf32>
    %27 = vector.shape_cast %26 : vector<256xf32> to vector<256x1xf32>
    %28 = vector.broadcast %27 : vector<256x1xf32> to vector<256x64xf32>
    %29 = arith.subf %25, %28 : vector<256x64xf32>
    %30 = math.exp %29 : vector<256x64xf32>
    %cst_15 = arith.constant dense<0.000000e+00> : vector<256xf32>
    %31 = vector.multi_reduction <add>, %30, %cst_15 [1] : vector<256x64xf32> to vector<256xf32>
    %32 = vector.shape_cast %31 : vector<256xf32> to vector<256x1xf32>
    %33 = arith.truncf %30 : vector<256x64xf32> to vector<256x64xbf16>
    %cst_16 = arith.constant dense<0.000000e+00> : vector<256x128xf32>
    %34 = tpu.matmul %33, %24, %cst_16 {dimension_numbers = #tpu.dot_dimension_numbers<[1], [0], [0], [1], [0, 0, 1, 1], [], []>} : vector<256x64xbf16>, vector<64x128xbf16>, vector<256x128xf32> -> vector<256x128xf32>
    %c0_17 = arith.constant 0 : index
    %35 = memref.load %arg5[%c0_17] : memref<1xf32, #tpu.memory_space<smem>>
    %36 = tpu.reciprocal %32 {approx = true} : vector<256x1xf32> -> vector<256x1xf32>
    %37 = vector.broadcast %35 : f32 to vector<256x1xf32>
    %38 = arith.mulf %37, %36 : vector<256x1xf32>
    %39 = vector.broadcast %38 : vector<256x1xf32> to vector<256x128xf32>
    %40 = arith.mulf %34, %39 : vector<256x128xf32>
    %41 = arith.addf %40, %1 : vector<256x128xf32>
    %c0_18 = arith.constant 0 : index
    %c0_19 = arith.constant 0 : index
    %c0_20 = arith.constant 0 : index
    %42 = vector.load %arg6[%c0_18, %c0_19, %c0_20] : memref<1x256x128xf32, #tpu.memory_space<vmem>>, vector<1x256x128xf32>
    %43 = vector.shape_cast %42 : vector<1x256x128xf32> to vector<256x128xf32>
    %44 = vector.shape_cast %41 : vector<256x128xf32> to vector<1x256x128xf32>
    tpu.vector_store %arg6[%c0_18, %c0_19, %c0_20], %44 {strides = array<i32>} : memref<1x256x128xf32, #tpu.memory_space<vmem>>, vector<1x256x128xf32>,
    return
  }
  func.func @transform_0(%arg0: i32) -> (i32, i32, i32) {
    %c0_i32 = arith.constant 0 : i32
    %c0_i32_0 = arith.constant 0 : i32
    %c0_i32_1 = arith.constant 0 : i32
    return %arg0, %c0_i32, %c0_i32_0 : i32, i32, i32
  }
  func.func @transform_1(%arg0: i32) -> (i32, i32) {
    %c0_i32 = arith.constant 0 : i32
    %c0_i32_0 = arith.constant 0 : i32
    %c0_i32_1 = arith.constant 0 : i32
    return %c0_i32, %c0_i32_0 : i32, i32
  }
  func.func @transform_2(%arg0: i32) -> (i32, i32) {
    %c0_i32 = arith.constant 0 : i32
    %c0_i32_0 = arith.constant 0 : i32
    %c0_i32_1 = arith.constant 0 : i32
    return %c0_i32, %c0_i32_0 : i32, i32
  }
  func.func @transform_3(%arg0: i32) -> (i32, i32) {
    %c0_i32 = arith.constant 0 : i32
    %c0_i32_0 = arith.constant 0 : i32
    %c0_i32_1 = arith.constant 0 : i32
    return %c0_i32, %c0_i32_0 : i32, i32
  }
  func.func @transform_4(%arg0: i32) -> i32 {
    %c0_i32 = arith.constant 0 : i32
    %c0_i32_0 = arith.constant 0 : i32
    return %c0_i32 : i32
  }
  func.func @transform_5(%arg0: i32) -> (i32, i32, i32) {
    %c0_i32 = arith.constant 0 : i32
    %c0_i32_0 = arith.constant 0 : i32
    %c0_i32_1 = arith.constant 0 : i32
    return %arg0, %c0_i32, %c0_i32_0 : i32, i32, i32
  }
}

</mosaic_0001>

<bundles_post_ra>
// kernel: pooled_self_attention_2d.1
= control target key start
LH: loop header
LB: loop body
LE: loop exit
PB: predicated region body
PF: predicated region fallthrough
CT: control target
= control target key end

     0   :  { %s2452_s20 = smov 0   ;;  %s3153_s0 = inlined_call_operand.vmem [shape: f32[2,256,128], index: 0, kind: input, shape index: {}, may-alias: {0,5}]   ;;  %s3154_s1 = inlined_call_operand.vmem [shape: bf16[128,80], index: 1, kind: input, shape index: {}]   ;;  %s3155_s2 = inlined_call_operand.vmem [shape: bf16[128,16], index: 2, kind: input, shape index: {}]   ;;  %s3156_s3 = inlined_call_operand.vmem [shape: bf16[64,128], index: 3, kind: input, shape index: {}]   ;;  %s3157_s4 = inlined_call_operand.<no memory space> [shape: f32[1], index: 4, kind: input, shape index: {}]   ;;  %s3158_s5 = inlined_call_operand.vmem [shape: f32[2,256,128], index: 5, kind: output, shape index: {}, may-alias: {0,5}]  }
   0x1   :  { %10 = sst [smem:[#allocation2]] %s3157_s4 }
   0x2 LB: > { %s1842_s21 = sadd.s32 4294967295, %s2416_s20   ;;  %p1846_p0 = scmp.ge.s32.totalorder %s2416_s20, 1  ;;  %s2416_s20 = sphi %s2452_s20, %s16_s20  }
   0x3   : > { %p188_p1 = scmp.lt.s32.totalorder %s2416_s20, 3 }
   0x5   : > { %p189_p2 = pnand %p1846_p0, %p188_p1 }
   0x7   : > { %192 = sbr.rel (%p189_p2) target bundleno = 1237 (0x4d5), region = 40 }
   0xe   : > { %v2463_v0 = vld [vmem:[%s3154_s1] sm:$0xff]   ;;  %p216_p3 = scmp.lt.s32.totalorder %s1842_s21, 1  ;;  %v2468_v1 = vld [vmem:[%s3154_s1 + $0x8] sm:$0xff]   ;;  %v2481_v2 = vld [vmem:[%s3154_s1 + $0x10] sm:$0xff]   ;;  %vm683_vm0 = vcmask 130048   ;;  %s2418_s28 = smov 112  }
   0xf   : > { %2015 = vmatprep.subr.bf16.mxu0 %v2463_v0  ;;  %2039 = vmatprep.subr.bf16.mxu1 %v2463_v0  ;;  %v2496_v3 = vld [vmem:[%s3154_s1 + $0x18] sm:$0xff]   ;;  %v2524_v10 = vld [vmem:[%s3154_s1 + $0x20] sm:$0xff]   ;;  %v2535_v11 = vld [vmem:[%s3154_s1 + $0x28] sm:$0xff]   ;;  %vm869_vm1 = vcmask 523264   ;;  %s1625_s19 = sld [smem:[#allocation2]] }
  0x10   : > { %s3196_s21 = smov (!%p216_p3, %s1842_s21), 1  ;;  %2016 = vmatpush3.bf16.msra.mxu0 %v2463_v0  ;;  %2040 = vmatpush3.bf16.msra.mxu1 %v2463_v0  ;;  %v2540_v12 = vld [vmem:[%s3154_s1 + $0x30] sm:$0xff]   ;;  %v2549_v13 = vld [vmem:[%s3154_s1 + $0x38] sm:$0xff]   ;;  %v2268_v56 = vld [vmem:[%s3155_s2] sm:$0xff]  }
  0x11   : > { %2017 = vmatprep.subr.bf16.mxu0 %v2468_v1  ;;  %2041 = vmatprep.subr.bf16.mxu1 %v2468_v1  ;;  %s1901_s27 = sshll.u32 %s3196_s21, 8  ;;  %v2276_v57 = vld [vmem:[%s3156_s3] sm:$0xff]   ;;  %v2277_v58 = vld [vmem:[%s3156_s3 + $0x8] sm:$0xff]   ;;  %v2278_v59 = vld [vmem:[%s3156_s3 + $0x10] sm:$0xff]  }
  0x12   : > { %s2489_s30 = scalar_lea.vmem %s3153_s0, %s1901_s27  ;;  %s3042_s4 = scalar_lea.vmem %s3158_s5, %s1901_s27 }
  0x13   : > { %v227_v4 = vld [vmem:[%s2489_s30] sm:$0xff]  ;;  %v2502_v5 = vld [vmem:[%s2489_s30 + $0x8] sm:$0xff]  ;;  %v229_v14 = vld [vmem:[%s2489_s30 + $0x10] sm:$0xff] }
  0x14   : > { %2018 = vmatpush3.bf16.msra.mxu0 %v2468_v1  ;;  %2042 = vmatpush3.bf16.msra.mxu1 %v2468_v1  ;;  %v2505_v6 = vld [vmem:[%s2489_s30 + $0x40] sm:$0xff]  ;;  %v2508_v7 = vpack.c.bf16 %v2502_v5, %v227_v4  ;;  %v2511_v8 = vld [vmem:[%s2489_s30 + $0x48] sm:$0xff]  ;;  %v2559_v15 = vld [vmem:[%s2489_s30 + $0x18] sm:$0xff] }
  0x15   : > { %2019 = vmatprep.subr.bf16.mxu0 %v2481_v2  ;;  %2043 = vmatprep.subr.bf16.mxu1 %v2481_v2  ;;  %v2515_v9 = vpack.c.bf16 %v2511_v8, %v2505_v6  ;;  %v2562_v16 = vld [vmem:[%s2489_s30 + $0x50] sm:$0xff]  ;;  %v2565_v17 = vld [vmem:[%s2489_s30 + $0x58] sm:$0xff]  ;;  %v2570_v18 = vld [vmem:[%s2489_s30 + $0x20] sm:$0xff]  ;;  %v2573_v19 = vpack.c.bf16 %v2559_v15, %v229_v14 }
  0x16   : > { %2031 = vmatprep.mubr.bf16.mxu0 %v2508_v7  ;;  %v2577_v20 = vpack.c.bf16 %v2565_v17, %v2562_v16  ;;  %v2580_v21 = vld [vmem:[%s2489_s30 + $0x28] sm:$0xff]  ;;  %v2583_v22 = vld [vmem:[%s2489_s30 + $0x60] sm:$0xff]  ;;  %v2603_v26 = vld [vmem:[%s2489_s30 + $0x30] sm:$0xff] }
  0x17   : > { %2055 = vmatprep.mubr.bf16.mxu1 %v2515_v9  ;;  %v2586_v23 = vld [vmem:[%s2489_s30 + $0x68] sm:$0xff]  ;;  %v2594_v24 = vpack.c.bf16 %v2580_v21, %v2570_v18  ;;  %v2608_v27 = vld [vmem:[%s2489_s30 + $0x38] sm:$0xff]  ;;  %v2611_v28 = vld [vmem:[%s2489_s30 + $0x70] sm:$0xff] }
  0x18   : > { %2020 = vmatpush3.bf16.msra.mxu0 %v2481_v2  ;;  %2044 = vmatpush3.bf16.msra.mxu1 %v2481_v2  ;;  %v2598_v25 = vpack.c.bf16 %v2586_v23, %v2583_v22  ;;  %v2614_v29 = vld [vmem:[%s2489_s30 + $0x78] sm:$0xff]  ;;  %v2621_v30 = vld [vmem:[%s2489_s30 + $0x80] sm:$0xff]  ;;  %v2625_v31 = vpack.c.bf16 %v2608_v27, %v2603_v26  ;;  %v2632_v33 = vld [vmem:[%s2489_s30 + $0x88] sm:$0xff] }
  0x19   : > { %2021 = vmatprep.subr.bf16.mxu0 %v2496_v3  ;;  %2045 = vmatprep.subr.bf16.mxu1 %v2496_v3  ;;  %v2629_v32 = vpack.c.bf16 %v2614_v29, %v2611_v28  ;;  %v2635_v34 = vld [vmem:[%s2489_s30 + $0xc0] sm:$0xff]  ;;  %v2638_v35 = vld [vmem:[%s2489_s30 + $0xc8] sm:$0xff]  ;;  %v2646_v36 = vpack.c.bf16 %v2632_v33, %v2621_v30  ;;  %v2673_v38 = vld [vmem:[%s2489_s30 + $0x90] sm:$0xff] }
  0x1a   : > { %3171 = vst [vmem:[#allocation3_spill] sm:$0xff] %v2635_v34  ;;  %3172 = vst [vmem:[#allocation4_spill] sm:$0xff] %v2638_v35  ;;  %v2650_v37 = vpack.c.bf16 %v2638_v35, %v2635_v34  ;;  %v2676_v39 = vld [vmem:[%s2489_s30 + $0x98] sm:$0xff]  ;;  %v2681_v40 = vld [vmem:[%s2489_s30 + $0xd0] sm:$0xff] }
  0x1b   : > { %3173 = vst [vmem:[#allocation5_spill] sm:$0xff] %v2681_v40  ;;  %v2684_v41 = vld [vmem:[%s2489_s30 + $0xd8] sm:$0xff]  ;;  %v2687_v42 = vld [vmem:[%s2489_s30 + $0xa0] sm:$0xff]  ;;  %v2692_v43 = vld [vmem:[%s2489_s30 + $0xa8] sm:$0xff]  ;;  %v2702_v46 = vpack.c.bf16 %v2676_v39, %v2673_v38 }
  0x1c   : > { %2022 = vmatpush3.bf16.msra.mxu0 %v2496_v3  ;;  %2046 = vmatpush3.bf16.msra.mxu1 %v2496_v3  ;;  %3174 = vst [vmem:[#allocation6_spill] sm:$0xff] %v2684_v41  ;;  %3175 = vst [vmem:[#allocation7_spill] sm:$0xff] %v2687_v42  ;;  %v2695_v44 = vld [vmem:[%s2489_s30 + $0xe0] sm:$0xff]  ;;  %v2698_v45 = vld [vmem:[%s2489_s30 + $0xe8] sm:$0xff]  ;;  %v2706_v47 = vpack.c.bf16 %v2684_v41, %v2681_v40  ;;  %v2712_v48 = vpack.c.bf16 %v2692_v43, %v2687_v42 }
  0x1d   : > { %2023 = vmatprep.subr.bf16.mxu0 %v2524_v10  ;;  %2047 = vmatprep.subr.bf16.mxu1 %v2524_v10  ;;  %3176 = vst [vmem:[#allocation8_spill] sm:$0xff] %v2692_v43  ;;  %3177 = vst [vmem:[#allocation9_spill] sm:$0xff] %v2695_v44  ;;  %v2716_v49 = vpack.c.bf16 %v2698_v45, %v2695_v44  ;;  %v2721_v50 = vld [vmem:[%s2489_s30 + $0xb0] sm:$0xff]  ;;  %v2725_v51 = vld [vmem:[%s2489_s30 + $0xb8] sm:$0xff] }
  0x1e   : > { %3178 = vst [vmem:[#allocation10_spill] sm:$0xff] %v2698_v45  ;;  %3179 = vst [vmem:[#allocation11_spill] sm:$0xff] %v2721_v50  ;;  %v2729_v52 = vld [vmem:[%s2489_s30 + $0xf0] sm:$0xff]  ;;  %v2732_v53 = vld [vmem:[%s2489_s30 + $0xf8] sm:$0xff]  ;;  %v2736_v54 = vpack.c.bf16 %v2725_v51, %v2721_v50 }
  0x1f   : > { %3180 = vst [vmem:[#allocation12_spill] sm:$0xff] %v2725_v51  ;;  %3181 = vst [vmem:[#allocation13_spill] sm:$0xff] %v2729_v52  ;;  %v2740_v55 = vpack.c.bf16 %v2732_v53, %v2729_v52 }
  0x20   : > { %2024 = vmatpush3.bf16.msra.mxu0 %v2524_v10  ;;  %2048 = vmatpush3.bf16.msra.mxu1 %v2524_v10  ;;  %3182 = vst [vmem:[#allocation14_spill] sm:$0xff] %v2732_v53 }
  0x21   : > { %2025 = vmatprep.subr.bf16.mxu0 %v2535_v11  ;;  %2049 = vmatprep.subr.bf16.mxu1 %v2535_v11 }
  0x24   : > { %2026 = vmatpush3.bf16.msra.mxu0 %v2535_v11  ;;  %2050 = vmatpush3.bf16.msra.mxu1 %v2535_v11 }
  0x25   : > { %2027 = vmatprep.subr.bf16.mxu0 %v2540_v12  ;;  %2051 = vmatprep.subr.bf16.mxu1 %v2540_v12 }
  0x28   : > { %2028 = vmatpush3.bf16.msra.mxu0 %v2540_v12  ;;  %2052 = vmatpush3.bf16.msra.mxu1 %v2540_v12 }
  0x29   : > { %2029 = vmatprep.subr.bf16.mxu0 %v2549_v13  ;;  %2053 = vmatprep.subr.bf16.mxu1 %v2549_v13 }
  0x2c   : > { %2030 = vmatpush3.bf16.msra.mxu0 %v2549_v13  ;;  %2054 = vmatpush3.bf16.msra.mxu1 %v2549_v13 }
  0x2d   : > { %2063 = vmatprep.subr.bf16.mxu0 %v2463_v0  ;;  %2087 = vmatprep.subr.bf16.mxu1 %v2463_v0 }
  0x2f   : > { %2032 = vmatmul.mubr.bf16.vlgmr.msra.gmra.mrb[0].mxu0 %v2573_v19  ;;  %2056 = vmatmul.mubr.bf16.vlgmr.msra.gmra.mrb[0].mxu1 %v2577_v20 }
  0x30   : > { %2064 = vmatpush3.bf16.msra.mxu0 %v2463_v0  ;;  %2088 = vmatpush3.bf16.msra.mxu1 %v2463_v0 }
  0x31   : > { %2065 = vmatprep.subr.bf16.mxu0 %v2468_v1  ;;  %2089 = vmatprep.subr.bf16.mxu1 %v2468_v1 }
  0x32   : > { %2035 = vmatprep.mubr.bf16.mxu0 %v2594_v24  ;;  %2059 = vmatprep.mubr.bf16.mxu1 %v2598_v25 }
  0x34   : > { %2066 = vmatpush3.bf16.msra.mxu0 %v2468_v1  ;;  %2090 = vmatpush3.bf16.msra.mxu1 %v2468_v1 }
  0x35   : > { %2067 = vmatprep.subr.bf16.mxu0 %v2481_v2  ;;  %2091 = vmatprep.subr.bf16.mxu1 %v2481_v2 }
  0x37   : > { %2036 = vmatmul.mubr.bf16.gmra.mrb[4].mxu0 %v2625_v31  ;;  %2060 = vmatmul.mubr.bf16.gmra.mrb[4].mxu1 %v2629_v32 }
  0x38   : > { %2068 = vmatpush3.bf16.msra.mxu0 %v2481_v2  ;;  %2092 = vmatpush3.bf16.msra.mxu1 %v2481_v2 }
  0x39   : > { %2069 = vmatprep.subr.bf16.mxu0 %v2496_v3  ;;  %2093 = vmatprep.subr.bf16.mxu1 %v2496_v3 }
  0x3a   : > { %2079 = vmatprep.mubr.bf16.mxu0 %v2646_v36  ;;  %2103 = vmatprep.mubr.bf16.mxu1 %v2650_v37 }
  0x3c   : > { %2070 = vmatpush3.bf16.msra.mxu0 %v2496_v3  ;;  %2094 = vmatpush3.bf16.msra.mxu1 %v2496_v3 }
  0x3d   : > { %2071 = vmatprep.subr.bf16.mxu0 %v2524_v10  ;;  %2095 = vmatprep.subr.bf16.mxu1 %v2524_v10 }
  0x40   : > { %2072 = vmatpush3.bf16.msra.mxu0 %v2524_v10  ;;  %2096 = vmatpush3.bf16.msra.mxu1 %v2524_v10 }
  0x41   : > { %2073 = vmatprep.subr.bf16.mxu0 %v2535_v11  ;;  %2097 = vmatprep.subr.bf16.mxu1 %v2535_v11 }
  0x44   : > { %2074 = vmatpush3.bf16.msra.mxu0 %v2535_v11  ;;  %2098 = vmatpush3.bf16.msra.mxu1 %v2535_v11 }
  0x45   : > { %2075 = vmatprep.subr.bf16.mxu0 %v2540_v12  ;;  %2099 = vmatprep.subr.bf16.mxu1 %v2540_v12 }
  0x48   : > { %2076 = vmatpush3.bf16.msra.mxu0 %v2540_v12  ;;  %2100 = vmatpush3.bf16.msra.mxu1 %v2540_v12 }
  0x49   : > { %2077 = vmatprep.subr.bf16.mxu0 %v2549_v13  ;;  %2101 = vmatprep.subr.bf16.mxu1 %v2549_v13 }
  0x4c   : > { %2078 = vmatpush3.bf16.msra.mxu0 %v2549_v13  ;;  %2102 = vmatpush3.bf16.msra.mxu1 %v2549_v13 }
  0x4d   : > { %2135 = vmatprep.subr.bf16.mxu1 %v2276_v57 }
  0x4f   : > { %2080 = vmatmul.mubr.bf16.vlgmr.msra.gmra.mrb[8].mxu0 %v2702_v46  ;;  %2104 = vmatmul.mubr.bf16.vlgmr.msra.gmra.mrb[8].mxu1 %v2706_v47 }
  0x50   : > { %2083 = vmatprep.mubr.bf16.mxu0 %v2712_v48  ;;  %2107 = vmatprep.mubr.bf16.mxu1 %v2716_v49 }
  0x51   : > { %2136 = vmatpush3.bf16.msra.mxu1 %v2276_v57 }
  0x52   : > { %2137 = vmatprep.subr.bf16.mxu1 %v2277_v58 }
  0x55   : > { %2138 = vmatpush3.bf16.msra.mxu1 %v2277_v58 }
  0x56   : > { %2139 = vmatprep.subr.bf16.mxu1 %v2278_v59 }
  0x57   : > { %2084 = vmatmul.mubr.bf16.gmra.mrb[12].mxu0 %v2736_v54  ;;  %2108 = vmatmul.mubr.bf16.gmra.mrb[12].mxu1 %v2740_v55 }
  0x58   : > { %2119 = vmatprep.mubr.msk.bf16.mxu0 %vm683_vm0, %v2268_v56 }
  0x59   : > { %2140 = vmatpush3.bf16.msra.mxu1 %v2278_v59 }
 0x102   : > { %v2033_v60 = vpop.f32.mrb[0].mxu0  ;;  %v2057_v61 = vpop.f32.mrb[0].mxu1 }
 0x103   : > { %v471_v62 = vmax.f32 %v2033_v60, %v2057_v61  ;;  %v373_v63 = vpop.f32.mrb[1].mxu0  ;;  %v438_v0 = vpop.f32.mrb[1].mxu1 }
 0x104   : > { %v469_v1 = vmax.f32 %v373_v63, %v438_v0  ;;  %v2034_v2 = vpop.f32.mrb[2].mxu0  ;;  %v2058_v3 = vpop.f32.mrb[2].mxu1  ;;  %v2279_v63 = vld [vmem:[%s3156_s3 + $0x18] sm:$0xff]  }
 0x105   : > { %v472_v4 = vmax.f32 %v2034_v2, %v2058_v3  ;;  %v376_v10 = vpop.f32.mrb[3].mxu0  ;;  %v441_v11 = vpop.f32.mrb[3].mxu1  ;;  %2141 = vmatprep.subr.bf16.mxu1 %v2279_v63 }
 0x106   : > { %v470_v12 = vmax.f32 %v376_v10, %v441_v11  ;;  %2142 = vmatpush3.bf16.msra.mxu1 %v2279_v63 }
 0x10a   : > { %v2037_v13 = vpop.f32.mrb[4].mxu0  ;;  %v2061_v14 = vpop.f32.mrb[4].mxu1 }
 0x10b   : > { %v475_v56 = vmax.f32 %v2037_v13, %v2061_v14  ;;  %v389_v57 = vpop.f32.mrb[5].mxu0  ;;  %v454_v45 = vpop.f32.mrb[5].mxu1 }
 0x10c   : > { %v473_v58 = vmax.f32 %v389_v57, %v454_v45  ;;  %v2038_v53 = vpop.f32.mrb[6].mxu0  ;;  %v2062_v59 = vpop.f32.mrb[6].mxu1 }
 0x10d   : > { %v476_v44 = vmax.f32 %v2038_v53, %v2062_v59  ;;  %v392_v52 = vpop.f32.mrb[7].mxu0  ;;  %v457_v60 = vpop.f32.mrb[7].mxu1 }
 0x10e   : > { %v474_v61 = vmax.f32 %v392_v52, %v457_v60 }
 0x122   : > { %v2081_v0 = vpop.f32.mrb[8].mxu0  ;;  %v2105_v2 = vpop.f32.mrb[8].mxu1 }
 0x123   : > { %v544_v3 = vmax.f32 %v471_v62, %v2081_v0  ;;  %v511_v10 = vpop.f32.mrb[9].mxu0  ;;  %v584_v11 = vpop.f32.mrb[9].mxu1 }
 0x124   : > { %v542_v13 = vmax.f32 %v469_v1, %v511_v10  ;;  %v2082_v14 = vpop.f32.mrb[10].mxu0  ;;  %v2106_v45 = vpop.f32.mrb[10].mxu1 }
 0x125   : > { %v617_v57 = vmax.f32 %v544_v3, %v2105_v2  ;;  %v545_v35 = vmax.f32 %v472_v4, %v2082_v14  ;;  %v514_v53 = vpop.f32.mrb[11].mxu0  ;;  %v587_v59 = vpop.f32.mrb[11].mxu1  ;;  %v2273_v14 = vld [vmem:[%s3155_s2 + $0x28] sm:$0xff]  }
 0x126   : > { %v615_v41 = vmax.f32 %v542_v13, %v584_v11  ;;  %v543_v52 = vmax.f32 %v470_v12, %v514_v53  ;;  %v2272_v13 = vld [vmem:[%s3155_s2 + $0x20] sm:$0xff]  }
 0x127   : > { %v618_v60 = vmax.f32 %v545_v35, %v2106_v45  ;;  %v2274_v45 = vld [vmem:[%s3155_s2 + $0x30] sm:$0xff]  }
 0x128   : > { %v616_v34 = vmax.f32 %v543_v52, %v587_v59 }
 0x129   : > { %v624_v40 = vpack.c.bf16 %v618_v60, %v617_v57  ;;  %v2275_v57 = vld [vmem:[%s3155_s2 + $0x38] sm:$0xff]  }
 0x12a   : > { %v623_v43 = vpack.c.bf16 %v616_v34, %v615_v41  ;;  %v2085_v51 = vpop.f32.mrb[12].mxu0  ;;  %v2109_v63 = vpop.f32.mrb[12].mxu1 }
 0x12b   : > { %v548_v42 = vmax.f32 %v475_v56, %v2085_v51  ;;  %v527_v50 = vpop.f32.mrb[13].mxu0  ;;  %v600_v62 = vpop.f32.mrb[13].mxu1  ;;  %v712_v11 = vsel %vm683_vm0, %v624_v40, 0 }
 0x12c   : > { %v546_v0 = vmax.f32 %v473_v58, %v527_v50  ;;  %837 = vrot.lane.b32.xlu0 %v623_v43, %s2418_s28  ;;  %v2086_v1 = vpop.f32.mrb[14].mxu0  ;;  %2247 = vmatprep.subr.msk.bf16.mxu0 %vm683_vm0, %v623_v43  ;;  %v709_v4 = vsel %vm683_vm0, %v623_v43, 0  ;;  %v2110_v2 = vpop.f32.mrb[14].mxu1 }
 0x12d   : > { %v621_v3 = vmax.f32 %v548_v42, %v2109_v63  ;;  %v549_v12 = vmax.f32 %v476_v44, %v2086_v1  ;;  %v530_v35 = vpop.f32.mrb[15].mxu0  ;;  %2112 = vmatpush3.bf16.xpose.msra.mxu0 %v709_v4  ;;  %v603_v10 = vpop.f32.mrb[15].mxu1  ;;  %v2269_v44 = vld [vmem:[%s3155_s2 + $0x8] sm:$0xff]  }
 0x12e   : > { %v547_v34 = vmax.f32 %v474_v61, %v530_v35  ;;  %v619_v41 = vmax.f32 %v546_v0, %v600_v62  ;;  %2248 = vmatprep.subr.msk.bf16.mxu0 %vm683_vm0, %v624_v40  ;;  %v2271_v61 = vld [vmem:[%s3155_s2 + $0x18] sm:$0xff]  }
 0x12f   : > { %v622_v51 = vmax.f32 %v549_v12, %v2110_v2 }
 0x130   : > { %v620_v56 = vmax.f32 %v547_v34, %v603_v10  ;;  %839 = vrot.lane.b32.xlu0 %v624_v40, %s2418_s28  ;;  %v2270_v40 = vld [vmem:[%s3155_s2 + $0x10] sm:$0xff]  }
 0x131   : > { %v626_v50 = vpack.c.bf16 %v622_v51, %v621_v3 }
 0x132   : > { %v625_v58 = vpack.c.bf16 %v620_v56, %v619_v41 }
 0x133   : > { %v718_v43 = vsel %vm683_vm0, %v626_v50, 0 }
 0x134   : > { %841 = vrot.lane.b32.xlu1 %v625_v58, %s2418_s28  ;;  %v715_v42 = vsel %vm683_vm0, %v625_v58, 0 }
 0x135   : > { %2114 = vmatpush3.bf16.xpose.msra.mxu0 %v712_v11 }
 0x136   : > { %2249 = vmatprep.subr.msk.bf16.mxu0 %vm683_vm0, %v625_v58 }
 0x138   : > { %843 = vrot.lane.b32.xlu1 %v626_v50, %s2418_s28 }
 0x13d   : > { %2116 = vmatpush3.bf16.xpose.msra.mxu0 %v715_v42 }
 0x13e   : > { %2250 = vmatprep.subr.msk.bf16.mxu0 %vm683_vm0, %v626_v50 }
 0x145   : > { %2118 = vmatpush3.bf16.xpose.msra.mxu0 %v718_v43 }
 0x14c   : > { %2120 = vmatmul.mubr.msk.bf16.vlgmr.msra.gmra.mrb[16].mxu0 %vm683_vm0, %v2269_v44 }
 0x14d   : > { %2123 = vmatprep.mubr.msk.bf16.mxu0 %vm683_vm0, %v2270_v40 }
 0x154   : > { %2124 = vmatmul.mubr.msk.bf16.gmra.mrb[20].mxu0 %vm683_vm0, %v2271_v61 }
 0x155   : > { %2127 = vmatprep.mubr.msk.bf16.mxu0 %vm683_vm0, %v2272_v13 }
 0x15c   : > { %2128 = vmatmul.mubr.msk.bf16.gmra.mrb[24].mxu0 %vm683_vm0, %v2273_v14 }
 0x15d   : > { %2131 = vmatprep.mubr.msk.bf16.mxu0 %vm683_vm0, %v2274_v45 }
 0x164   : > { %2132 = vmatmul.mubr.msk.bf16.gmra.mrb[28].mxu0 %vm683_vm0, %v2275_v57 }
 0x19e   : > { %v838_v53 = vpop.permute.xlu0 %837 }
 0x19f   : > { %2143 = vmatprep.mubr.msk.bf16.mxu1 %vm869_vm1, %v838_v53 }
 0x1a2   : > { %v840_v59 = vpop.permute.xlu0 %839 }
 0x1a3   : > { %2144 = vmatmul.mubr.msk.bf16.vlgmr.msra.gmra.mrb[16].mxu1 %vm869_vm1, %v840_v59 }
 0x1a6   : > { %v842_v52 = vpop.permute.xlu1 %841 }
 0x1a7   : > { %2147 = vmatprep.mubr.msk.bf16.mxu1 %vm869_vm1, %v842_v52 }
 0x1aa   : > { %v844_v60 = vpop.permute.xlu1 %843 }
 0x1ab   : > { %2148 = vmatmul.mubr.msk.bf16.gmra.mrb[20].mxu1 %vm869_vm1, %v844_v60 }
 0x1ac   : > { %2167 = vmatprep.mubr.bf16.mxu1 %v2508_v7 }
 0x21f   : > { %v2121_v63 = vpop.f32.mrb[16].mxu0 }
 0x220   : > { %v754_v62 = vpop.f32.mrb[17].mxu0 }
 0x221   : > { %v2122_v0 = vpop.f32.mrb[18].mxu0 }
 0x222   : > { %v818_v1 = vpack.c.bf16 %v2122_v0, %v2121_v63  ;;  %v757_v4 = vpop.f32.mrb[19].mxu0 }
 0x223   : > { %v817_v2 = vpack.c.bf16 %v757_v4, %v754_v62 }
 0x225   : > { %2151 = vmatprep.subr.bf16.mxu1 %v817_v2 }
 0x226   : > { %2152 = vmatpush3.bf16.msra.mxu1 %v817_v2 }
 0x227   : > { %v2125_v3 = vpop.f32.mrb[20].mxu0  ;;  %2153 = vmatprep.subr.bf16.mxu1 %v818_v1 }
 0x228   : > { %v770_v12 = vpop.f32.mrb[21].mxu0 }
 0x229   : > { %v2126_v35 = vpop.f32.mrb[22].mxu0 }
 0x22a   : > { %v820_v10 = vpack.c.bf16 %v2126_v35, %v2125_v3  ;;  %v773_v34 = vpop.f32.mrb[23].mxu0  ;;  %2154 = vmatpush3.bf16.msra.mxu1 %v818_v1 }
 0x22b   : > { %v819_v41 = vpack.c.bf16 %v773_v34, %v770_v12 }
 0x22d   : > { %2155 = vmatprep.subr.bf16.mxu1 %v819_v41 }
 0x22e   : > { %2156 = vmatpush3.bf16.msra.mxu1 %v819_v41 }
 0x22f   : > { %v2129_v51 = vpop.f32.mrb[24].mxu0  ;;  %2157 = vmatprep.subr.bf16.mxu1 %v820_v10 }
 0x230   : > { %v786_v7 = vpop.f32.mrb[25].mxu0 }
 0x231   : > { %v2130_v56 = vpop.f32.mrb[26].mxu0 }
 0x232   : > { %v822_v50 = vpack.c.bf16 %v2130_v56, %v2129_v51  ;;  %v789_v58 = vpop.f32.mrb[27].mxu0  ;;  %2158 = vmatpush3.bf16.msra.mxu1 %v820_v10 }
 0x233   : > { %v821_v11 = vpack.c.bf16 %v789_v58, %v786_v7 }
 0x235   : > { %2159 = vmatprep.subr.bf16.mxu1 %v821_v11 }
 0x236   : > { %2160 = vmatpush3.bf16.msra.mxu1 %v821_v11 }
 0x237   : > { %v2133_v42 = vpop.f32.mrb[28].mxu0  ;;  %2161 = vmatprep.subr.bf16.mxu1 %v822_v50 }
 0x238   : > { %v802_v43 = vpop.f32.mrb[29].mxu0 }
 0x239   : > { %v2134_v44 = vpop.f32.mrb[30].mxu0 }
 0x23a   : > { %v824_v40 = vpack.c.bf16 %v2134_v44, %v2133_v42  ;;  %v805_v61 = vpop.f32.mrb[31].mxu0  ;;  %2162 = vmatpush3.bf16.msra.mxu1 %v822_v50 }
 0x23b   : > { %v823_v13 = vpack.c.bf16 %v805_v61, %v802_v43 }
 0x23d   : > { %2163 = vmatprep.subr.bf16.mxu1 %v823_v13 }
 0x23e   : > { %2164 = vmatpush3.bf16.msra.mxu1 %v823_v13 }
 0x23f   : > { %2165 = vmatprep.subr.bf16.mxu1 %v824_v40 }
 0x242   : > { %2166 = vmatpush3.bf16.msra.mxu1 %v824_v40 }
 0x245   : > { %2168 = vmatmul.mubr.bf16.vlgmr.msra.gmra.mrb[24].mxu1 %v2573_v19 }
 0x246   : > { %2171 = vmatprep.mubr.bf16.mxu1 %v2594_v24 }
 0x24d   : > { %2172 = vmatmul.mubr.bf16.gmra.mrb[28].mxu1 %v2625_v31 }
 0x24e   : > { %2175 = vmatprep.mubr.bf16.mxu1 %v2515_v9 }
 0x255   : > { %2176 = vmatmul.mubr.bf16.gmra.mrb[32].mxu1 %v2577_v20 }
 0x256   : > { %2179 = vmatprep.mubr.bf16.mxu1 %v2598_v25 }
 0x25d   : > { %2180 = vmatmul.mubr.bf16.gmra.mrb[36].mxu1 %v2629_v32 }
 0x25e   : > { %2183 = vmatprep.mubr.bf16.mxu1 %v2646_v36 }
 0x265   : > { %2184 = vmatmul.mubr.bf16.gmra.mrb[40].mxu1 %v2702_v46 }
 0x266   : > { %2187 = vmatprep.mubr.bf16.mxu1 %v2712_v48 }
 0x26d   : > { %2188 = vmatmul.mubr.bf16.gmra.mrb[44].mxu1 %v2736_v54 }
 0x26e   : > { %2191 = vmatprep.mubr.bf16.mxu1 %v2650_v37 }
 0x275   : > { %2192 = vmatmul.mubr.bf16.gmra.mrb[48].mxu1 %v2706_v47 }
 0x276   : > { %v2145_v19 = vpop.f32.mrb[16].mxu1  ;;  %2195 = vmatprep.mubr.bf16.mxu1 %v2716_v49 }
 0x277   : > { %v916_v9 = vpop.f32.mrb[17].mxu1 }
 0x278   : > { %v2146_v20 = vpop.f32.mrb[18].mxu1 }
 0x279   : > { %v948_v24 = vpack.c.bf16 %v2146_v20, %v2145_v19  ;;  %v919_v25 = vpop.f32.mrb[19].mxu1 }
 0x27a   : > { %v947_v31 = vpack.c.bf16 %v919_v25, %v916_v9 }
 0x27c   : > { %2199 = vmatprep.subr.bf16.mxu0 %v947_v31  ;;  %2239 = vmatprep.subr.bf16.mxu1 %v947_v31 }
 0x27d   : > { %2196 = vmatmul.mubr.bf16.gmra.mrb[52].mxu1 %v2740_v55  ;;  %2200 = vmatpush3.bf16.msra.mxu0 %v947_v31 }
 0x27e   : > { %2243 = vmatpush3.bf16.msra.mxu1 %v947_v31  ;;  %v2149_v32 = vpop.f32.mrb[20].mxu1  ;;  %2201 = vmatprep.subr.bf16.mxu0 %v948_v24 }
 0x27f   : > { %2240 = vmatprep.subr.bf16.mxu1 %v948_v24  ;;  %v932_v36 = vpop.f32.mrb[21].mxu1 }
 0x280   : > { %v2150_v37 = vpop.f32.mrb[22].mxu1 }
 0x281   : > { %v950_v46 = vpack.c.bf16 %v2150_v37, %v2149_v32  ;;  %v935_v47 = vpop.f32.mrb[23].mxu1  ;;  %2202 = vmatpush3.bf16.msra.mxu0 %v948_v24 }
 0x282   : > { %v949_v48 = vpack.c.bf16 %v935_v47, %v932_v36  ;;  %2244 = vmatpush3.bf16.msra.mxu1 %v948_v24 }
 0x284   : > { %2203 = vmatprep.subr.bf16.mxu0 %v949_v48  ;;  %2241 = vmatprep.subr.bf16.mxu1 %v949_v48 }
 0x285   : > { %2204 = vmatpush3.bf16.msra.mxu0 %v949_v48 }
 0x286   : > { %2245 = vmatpush3.bf16.msra.mxu1 %v949_v48  ;;  %2205 = vmatprep.subr.bf16.mxu0 %v950_v46 }
 0x287   : > { %2242 = vmatprep.subr.bf16.mxu1 %v950_v46 }
 0x289   : > { %2206 = vmatpush3.bf16.msra.mxu0 %v950_v46 }
 0x28a   : > { %2246 = vmatpush3.bf16.msra.mxu1 %v950_v46 }
 0x318   : > { %v2816_v49 = vpop.f32.mrb[24].mxu1 }
 0x319   : > { %v2818_v54 = vpop.f32.mrb[25].mxu1  ;;  %v1118_v55 = vsel %vm869_vm1, %v2816_v49, -inf }
 0x31a   : > { %1119 = vmax.xlane.f32.xlu0 %v1118_v55  ;;  %v2822_v14 = vpop.f32.mrb[26].mxu1  ;;  %v1112_v53 = vsel %vm869_vm1, %v2818_v54, -inf }
 0x31b   : > { %v2824_v45 = vpop.f32.mrb[27].mxu1  ;;  %v1121_v60 = vsel %vm869_vm1, %v2822_v14, -inf }
 0x31c   : > { %v1115_v57 = vsel %vm869_vm1, %v2824_v45, -inf }
 0x31d   : > { %1116 = vmax.xlane.f32.xlu1 %v1115_v57 }
 0x31e   : > { %1113 = vmax.xlane.f32.xlu0 %v1112_v53 }
 0x320   : > { %v2830_v59 = vpop.f32.mrb[28].mxu1 }
 0x321   : > { %v2832_v52 = vpop.f32.mrb[29].mxu1  ;;  %v1130_v63 = vsel %vm869_vm1, %v2830_v59, -inf }
 0x322   : > { %1122 = vmax.xlane.f32.xlu0 %v1121_v60  ;;  %1131 = vmax.xlane.f32.xlu1 %v1130_v63  ;;  %v2838_v62 = vpop.f32.mrb[30].mxu1  ;;  %v1124_v1 = vsel %vm869_vm1, %v2832_v52, -inf }
 0x323   : > { %v2840_v0 = vpop.f32.mrb[31].mxu1  ;;  %v1133_v4 = vsel %vm869_vm1, %v2838_v62, -inf }
 0x324   : > { %v1127_v12 = vsel %vm869_vm1, %v2840_v0, -inf }
 0x326   : > { %1125 = vmax.xlane.f32.xlu1 %v1124_v1  ;;  %1134 = vmax.xlane.f32.xlu0 %v1133_v4 }
 0x328   : > { %v2846_v2 = vpop.f32.mrb[32].mxu1 }
 0x329   : > { %v2848_v3 = vpop.f32.mrb[33].mxu1  ;;  %v1142_v35 = vsel %vm869_vm1, %v2846_v2, -inf }
 0x32a   : > { %1128 = vmax.xlane.f32.xlu0 %v1127_v12  ;;  %1143 = vmax.xlane.f32.xlu1 %v1142_v35  ;;  %v2854_v10 = vpop.f32.mrb[34].mxu1  ;;  %v1136_v41 = vsel %vm869_vm1, %v2848_v3, -inf }
 0x32b   : > { %v2856_v34 = vpop.f32.mrb[35].mxu1  ;;  %v1145_v51 = vsel %vm869_vm1, %v2854_v10, -inf }
 0x32c   : > { %v1139_v50 = vsel %vm869_vm1, %v2856_v34, -inf }
 0x32e   : > { %1137 = vmax.xlane.f32.xlu1 %v1136_v41  ;;  %1146 = vmax.xlane.f32.xlu0 %v1145_v51 }
 0x330   : > { %v2862_v7 = vpop.f32.mrb[36].mxu1 }
 0x331   : > { %v2864_v56 = vpop.f32.mrb[37].mxu1  ;;  %v1154_v58 = vsel %vm869_vm1, %v2862_v7, -inf }
 0x332   : > { %1140 = vmax.xlane.f32.xlu0 %v1139_v50  ;;  %1155 = vmax.xlane.f32.xlu1 %v1154_v58  ;;  %v2870_v11 = vpop.f32.mrb[38].mxu1  ;;  %v1148_v43 = vsel %vm869_vm1, %v2864_v56, -inf }
 0x333   : > { %v2872_v42 = vpop.f32.mrb[39].mxu1  ;;  %v1157_v44 = vsel %vm869_vm1, %v2870_v11, -inf }
 0x334   : > { %v1151_v13 = vsel %vm869_vm1, %v2872_v42, -inf }
 0x336   : > { %1149 = vmax.xlane.f32.xlu1 %v1148_v43  ;;  %1158 = vmax.xlane.f32.xlu0 %v1157_v44 }
 0x338   : > { %v2878_v40 = vpop.f32.mrb[40].mxu1 }
 0x339   : > { %v2880_v61 = vpop.f32.mrb[41].mxu1  ;;  %v1166_v19 = vsel %vm869_vm1, %v2878_v40, -inf }
 0x33a   : > { %1152 = vmax.xlane.f32.xlu0 %v1151_v13  ;;  %1167 = vmax.xlane.f32.xlu1 %v1166_v19  ;;  %v2886_v9 = vpop.f32.mrb[42].mxu1  ;;  %v1160_v24 = vsel %vm869_vm1, %v2880_v61, -inf }
 0x33b   : > { %v2888_v20 = vpop.f32.mrb[43].mxu1  ;;  %v1169_v25 = vsel %vm869_vm1, %v2886_v9, -inf }
 0x33c   : > { %v1163_v36 = vsel %vm869_vm1, %v2888_v20, -inf }
 0x33e   : > { %1161 = vmax.xlane.f32.xlu1 %v1160_v24  ;;  %1170 = vmax.xlane.f32.xlu0 %v1169_v25 }
 0x340   : > { %v2894_v31 = vpop.f32.mrb[44].mxu1 }
 0x341   : > { %v2896_v32 = vpop.f32.mrb[45].mxu1  ;;  %v1178_v37 = vsel %vm869_vm1, %v2894_v31, -inf }
 0x342   : > { %1164 = vmax.xlane.f32.xlu0 %v1163_v36  ;;  %1179 = vmax.xlane.f32.xlu1 %v1178_v37  ;;  %v2902_v46 = vpop.f32.mrb[46].mxu1  ;;  %v1172_v48 = vsel %vm869_vm1, %v2896_v32, -inf }
 0x343   : > { %v2904_v47 = vpop.f32.mrb[47].mxu1  ;;  %v1181_v55 = vsel %vm869_vm1, %v2902_v46, -inf }
 0x344   : > { %v1175_v60 = vsel %vm869_vm1, %v2904_v47, -inf }
 0x346   : > { %1173 = vmax.xlane.f32.xlu1 %v1172_v48  ;;  %1182 = vmax.xlane.f32.xlu0 %v1181_v55 }
 0x348   : > { %v2910_v57 = vpop.f32.mrb[48].mxu1 }
 0x349   : > { %v2912_v53 = vpop.f32.mrb[49].mxu1  ;;  %v1190_v63 = vsel %vm869_vm1, %v2910_v57, -inf }
 0x34a   : > { %1176 = vmax.xlane.f32.xlu0 %v1175_v60  ;;  %1191 = vmax.xlane.f32.xlu1 %v1190_v63  ;;  %v2918_v1 = vpop.f32.mrb[50].mxu1  ;;  %v1184_v12 = vsel %vm869_vm1, %v2912_v53, -inf }
 0x34b   : > { %v2920_v4 = vpop.f32.mrb[51].mxu1  ;;  %v1193_v35 = vsel %vm869_vm1, %v2918_v1, -inf }
 0x34c   : > { %v1187_v50 = vsel %vm869_vm1, %v2920_v4, -inf }
 0x34e   : > { %1185 = vmax.xlane.f32.xlu1 %v1184_v12  ;;  %1194 = vmax.xlane.f32.xlu0 %v1193_v35 }
 0x350   : > { %v2926_v41 = vpop.f32.mrb[52].mxu1 }
 0x351   : > { %v2928_v51 = vpop.f32.mrb[53].mxu1  ;;  %v1202_v19 = vsel %vm869_vm1, %v2926_v41, -inf }
 0x352   : > { %1188 = vmax.xlane.f32.xlu0 %v1187_v50  ;;  %v2932_v58 = vpop.f32.mrb[54].mxu1  ;;  %v1196_v43 = vsel %vm869_vm1, %v2928_v51, -inf }
 0x353   : > { %1197 = vmax.xlane.f32.xlu1 %v1196_v43  ;;  %v2936_v44 = vpop.f32.mrb[55].mxu1  ;;  %v1205_v24 = vsel %vm869_vm1, %v2932_v58, -inf }
 0x354   : > { %v1199_v13 = vsel %vm869_vm1, %v2936_v44, -inf }
 0x356   : > { %1200 = vmax.xlane.f32.xlu0 %v1199_v13 }
 0x357   : > { %1203 = vmax.xlane.f32.xlu1 %v1202_v19 }
 0x35a   : > { %1206 = vmax.xlane.f32.xlu0 %v1205_v24 }
 0x3a7   : > { %v1120_v25 = vpop.xlane.xlu0 %1119 }
 0x3a8   : > { %v1210_v36 = vsub.f32 %v2816_v49, %v1120_v25 }
 0x3aa   : > { %v1244_v37 = vmul.f32 1.442695, %v1210_v36  ;;  %v1117_v48 = vpop.xlane.xlu1 %1116 }
 0x3ab   : > { %v1209_v55 = vsub.f32 %v2824_v45, %v1117_v48  ;;  %v1114_v60 = vpop.xlane.xlu0 %1113 }
 0x3ac   : > { %2280 = vpow2.f32 %v1244_v37  ;;  %v1208_v63 = vsub.f32 %v2818_v54, %v1114_v60 }
 0x3ad   : > { %v1242_v12 = vmul.f32 1.442695, %v1209_v55 }
 0x3ae   : > { %v1240_v35 = vmul.f32 1.442695, %v1208_v63 }
 0x3af   : > { %2282 = vpow2.f32 %v1242_v12  ;;  %v1123_v50 = vpop.xlane.xlu0 %1122  ;;  %v1132_v43 = vpop.xlane.xlu1 %1131 }
 0x3b0   : > { %2284 = vpow2.f32 %v1240_v35  ;;  %v1211_v13 = vsub.f32 %v2822_v14, %v1123_v50  ;;  %v1214_v19 = vsub.f32 %v2830_v59, %v1132_v43 }
 0x3b2   : > { %v1246_v24 = vmul.f32 1.442695, %v1211_v13  ;;  %v1252_v49 = vmul.f32 1.442695, %v1214_v19 }
 0x3b3   : > { %v1126_v25 = vpop.xlane.xlu1 %1125  ;;  %v1135_v36 = vpop.xlane.xlu0 %1134 }
 0x3b4   : > { %2286 = vpow2.f32 %v1246_v24  ;;  %v1212_v45 = vsub.f32 %v2832_v52, %v1126_v25  ;;  %v1215_v37 = vsub.f32 %v2838_v62, %v1135_v36 }
 0x3b5   : > { %2288 = vpow2.f32 %v1252_v49 }
 0x3b6   : > { %v2281_v54 = vpop.eup %2280  ;;  %v1248_v48 = vmul.f32 1.442695, %v1212_v45  ;;  %v1254_v55 = vmul.f32 1.442695, %v1215_v37 }
 0x3b7   : > { %v1129_v60 = vpop.xlane.xlu0 %1128  ;;  %v1144_v63 = vpop.xlane.xlu1 %1143  ;;  %v1310_v12 = vsel %vm869_vm1, %v2281_v54, 0.0 }
 0x3b8   : > { %2290 = vpow2.f32 %v1248_v48  ;;  %v1213_v14 = vsub.f32 %v2840_v0, %v1129_v60  ;;  %v1218_v59 = vsub.f32 %v2846_v2, %v1144_v63  ;;  %1311 = vadd.xlane.f32.xlu1 %v1310_v12 }
 0x3b9   : > { %v2283_v35 = vpop.eup %2282  ;;  %2292 = vpow2.f32 %v1254_v55 }
 0x3ba   : > { %v2285_v50 = vpop.eup %2284  ;;  %v1250_v52 = vmul.f32 1.442695, %v1213_v14  ;;  %v1260_v43 = vmul.f32 1.442695, %v1218_v59 }
 0x3bb   : > { %v1138_v62 = vpop.xlane.xlu1 %1137  ;;  %v1147_v13 = vpop.xlane.xlu0 %1146  ;;  %v1304_v19 = vsel %vm869_vm1, %v2285_v50, 0.0  ;;  %v1400_v24 = vpack.c.bf16 %v2283_v35, %v2285_v50 }
 0x3bc   : > { %2294 = vpow2.f32 %v1250_v52  ;;  %v1216_v49 = vsub.f32 %v2848_v3, %v1138_v62  ;;  %v1219_v25 = vsub.f32 %v2854_v10, %v1147_v13  ;;  %1305 = vadd.xlane.f32.xlu1 %v1304_v19  ;;  %v1307_v62 = vsel %vm869_vm1, %v2283_v35, 0.0 }
 0x3bd   : > { %2296 = vpow2.f32 %v1260_v43  ;;  %2207 = vmatprep.mubr.msk.bf16.mxu0 %vm869_vm1, %v1400_v24 }
 0x3be   : > { %v2287_v0 = vpop.eup %2286  ;;  %v1256_v2 = vmul.f32 1.442695, %v1216_v49  ;;  %v1262_v36 = vmul.f32 1.442695, %v1219_v25 }
 0x3bf   : > { %v2289_v45 = vpop.eup %2288  ;;  %v1401_v37 = vpack.c.bf16 %v2287_v0, %v2281_v54  ;;  %v1141_v48 = vpop.xlane.xlu0 %1140  ;;  %v1313_v60 = vsel %vm869_vm1, %v2287_v0, 0.0 }
 0x3c0   : > { %v1156_v55 = vpop.xlane.xlu1 %1155  ;;  %2298 = vpow2.f32 %v1256_v2  ;;  %v1217_v63 = vsub.f32 %v2856_v34, %v1141_v48  ;;  %v1322_v10 = vsel %vm869_vm1, %v2289_v45, 0.0  ;;  %1314 = vadd.xlane.f32.xlu0 %v1313_v60 }
 0x3c1   : > { %v1222_v3 = vsub.f32 %v2862_v7, %v1156_v55  ;;  %2300 = vpow2.f32 %v1262_v36  ;;  %1323 = vadd.xlane.f32.xlu1 %v1322_v10  ;;  %2208 = vmatmul.mubr.msk.bf16.vlgmr.msra.gmra.mrb[32].mxu0 %vm869_vm1, %v1401_v37 }
 0x3c2   : > { %v2291_v12 = vpop.eup %2290  ;;  %v1258_v14 = vmul.f32 1.442695, %v1217_v63 }
 0x3c3   : > { %v1268_v59 = vmul.f32 1.442695, %v1222_v3  ;;  %v2293_v54 = vpop.eup %2292  ;;  %v1159_v52 = vpop.xlane.xlu0 %1158  ;;  %v1316_v43 = vsel %vm869_vm1, %v2291_v12, 0.0 }
 0x3c4   : > { %v1150_v50 = vpop.xlane.xlu1 %1149  ;;  %2302 = vpow2.f32 %v1258_v14  ;;  %v1223_v7 = vsub.f32 %v2870_v11, %v1159_v52  ;;  %1308 = vadd.xlane.f32.xlu0 %v1307_v62  ;;  %v1403_v13 = vpack.c.bf16 %v2293_v54, %v2289_v45  ;;  %v1325_v36 = vsel %vm869_vm1, %v2293_v54, 0.0 }
 0x3c5   : > { %v1220_v34 = vsub.f32 %v2864_v56, %v1150_v50  ;;  %2304 = vpow2.f32 %v1268_v59  ;;  %1317 = vadd.xlane.f32.xlu1 %v1316_v43 }
 0x3c6   : > { %v2295_v19 = vpop.eup %2294  ;;  %v1270_v49 = vmul.f32 1.442695, %v1223_v7 }
 0x3c7   : > { %v1264_v24 = vmul.f32 1.442695, %v1220_v34  ;;  %v2297_v25 = vpop.eup %2296  ;;  %v1153_v0 = vpop.xlane.xlu0 %1152  ;;  %v1402_v37 = vpack.c.bf16 %v2295_v19, %v2291_v12 }
 0x3c8   : > { %v1168_v2 = vpop.xlane.xlu1 %1167  ;;  %v1221_v35 = vsub.f32 %v2872_v42, %v1153_v0  ;;  %v1334_v11 = vsel %vm869_vm1, %v2297_v25, 0.0  ;;  %1326 = vadd.xlane.f32.xlu0 %v1325_v36  ;;  %v1319_v42 = vsel %vm869_vm1, %v2295_v19, 0.0 }
 0x3c9   : > { %2306 = vpow2.f32 %v1264_v24  ;;  %v1226_v56 = vsub.f32 %v2878_v40, %v1168_v2  ;;  %1335 = vadd.xlane.f32.xlu1 %v1334_v11  ;;  %2211 = vmatprep.mubr.msk.bf16.mxu0 %vm869_vm1, %v1402_v37 }
 0x3ca   : > { %2308 = vpow2.f32 %v1270_v49  ;;  %v2299_v45 = vpop.eup %2298  ;;  %v1266_v48 = vmul.f32 1.442695, %v1221_v35  ;;  %2212 = vmatmul.mubr.msk.bf16.gmra.mrb[36].mxu0 %vm869_vm1, %v1403_v13 }
 0x3cb   : > { %v1276_v55 = vmul.f32 1.442695, %v1226_v56  ;;  %v2301_v60 = vpop.eup %2300  ;;  %v1171_v3 = vpop.xlane.xlu0 %1170  ;;  %v1328_v10 = vsel %vm869_vm1, %v2299_v45, 0.0 }
 0x3cc   : > { %v1162_v63 = vpop.xlane.xlu1 %1161  ;;  %2310 = vpow2.f32 %v1266_v48  ;;  %v1227_v12 = vsub.f32 %v2886_v9, %v1171_v3  ;;  %1320 = vadd.xlane.f32.xlu0 %v1319_v42  ;;  %v1405_v14 = vpack.c.bf16 %v2301_v60, %v2297_v25  ;;  %v1337_v34 = vsel %vm869_vm1, %v2301_v60, 0.0 }
 0x3cd   : > { %v1224_v40 = vsub.f32 %v2880_v61, %v1162_v63  ;;  %2312 = vpow2.f32 %v1276_v55  ;;  %1329 = vadd.xlane.f32.xlu1 %v1328_v10 }
 0x3ce   : > { %v2303_v59 = vpop.eup %2302  ;;  %v1278_v50 = vmul.f32 1.442695, %v1227_v12 }
 0x3cf   : > { %v1272_v54 = vmul.f32 1.442695, %v1224_v40  ;;  %v2305_v52 = vpop.eup %2304  ;;  %v1165_v43 = vpop.xlane.xlu0 %1164  ;;  %v1404_v7 = vpack.c.bf16 %v2303_v59, %v2299_v45 }
 0x3d0   : > { %v1180_v62 = vpop.xlane.xlu1 %1179  ;;  %v1225_v13 = vsub.f32 %v2888_v20, %v1165_v43  ;;  %v1346_v9 = vsel %vm869_vm1, %v2305_v52, 0.0  ;;  %1338 = vadd.xlane.f32.xlu0 %v1337_v34  ;;  %v1331_v20 = vsel %vm869_vm1, %v2303_v59, 0.0 }
 0x3d1   : > { %2314 = vpow2.f32 %v1272_v54  ;;  %v1230_v61 = vsub.f32 %v2894_v31, %v1180_v62  ;;  %1347 = vadd.xlane.f32.xlu1 %v1346_v9  ;;  %2215 = vmatprep.mubr.msk.bf16.mxu0 %vm869_vm1, %v1404_v7 }
 0x3d2   : > { %2316 = vpow2.f32 %v1278_v50  ;;  %v1274_v24 = vmul.f32 1.442695, %v1225_v13  ;;  %2216 = vmatmul.mubr.msk.bf16.gmra.mrb[40].mxu0 %vm869_vm1, %v1405_v14 }
 0x3d3   : > { %v2307_v19 = vpop.eup %2306  ;;  %v1284_v49 = vmul.f32 1.442695, %v1230_v61  ;;  %v1183_v2 = vpop.xlane.xlu0 %1182 }
 0x3d4   : > { %v2309_v25 = vpop.eup %2308  ;;  %v1174_v0 = vpop.xlane.xlu1 %1173  ;;  %v1340_v36 = vsel %vm869_vm1, %v2307_v19, 0.0  ;;  %2318 = vpow2.f32 %v1274_v24  ;;  %v1231_v37 = vsub.f32 %v2902_v46, %v1183_v2  ;;  %1332 = vadd.xlane.f32.xlu0 %v1331_v20 }
 0x3d5   : > { %v1228_v31 = vsub.f32 %v2896_v32, %v1174_v0  ;;  %2320 = vpow2.f32 %v1284_v49  ;;  %1341 = vadd.xlane.f32.xlu1 %v1340_v36  ;;  %v1407_v35 = vpack.c.bf16 %v2309_v25, %v2305_v52  ;;  %v1349_v63 = vsel %vm869_vm1, %v2309_v25, 0.0 }
 0x3d6   : > { %v2311_v56 = vpop.eup %2310  ;;  %v1286_v45 = vmul.f32 1.442695, %v1231_v37 }
 0x3d7   : > { %v1280_v11 = vmul.f32 1.442695, %v1228_v31  ;;  %v2313_v48 = vpop.eup %2312  ;;  %v1177_v55 = vpop.xlane.xlu0 %1176  ;;  %v1406_v3 = vpack.c.bf16 %v2311_v56, %v2307_v19 }
 0x3d8   : > { %v1192_v60 = vpop.xlane.xlu1 %1191  ;;  %v1229_v10 = vsub.f32 %v2904_v47, %v1177_v55  ;;  %v1358_v46 = vsel %vm869_vm1, %v2313_v48, 0.0  ;;  %1350 = vadd.xlane.f32.xlu0 %v1349_v63  ;;  %v1343_v47 = vsel %vm869_vm1, %v2311_v56, 0.0 }
 0x3d9   : > { %2322 = vpow2.f32 %v1280_v11  ;;  %v1234_v32 = vsub.f32 %v2910_v57, %v1192_v60  ;;  %1359 = vadd.xlane.f32.xlu1 %v1358_v46  ;;  %2219 = vmatprep.mubr.msk.bf16.mxu0 %vm869_vm1, %v1406_v3 }
 0x3da   : > { %2324 = vpow2.f32 %v1286_v45  ;;  %v1282_v40 = vmul.f32 1.442695, %v1229_v10  ;;  %2220 = vmatmul.mubr.msk.bf16.gmra.mrb[44].mxu0 %vm869_vm1, %v1407_v35 }
 0x3db   : > { %v2315_v42 = vpop.eup %2314  ;;  %v1292_v12 = vmul.f32 1.442695, %v1234_v32  ;;  %v1195_v54 = vpop.xlane.xlu0 %1194 }
 0x3dc   : > { %v2317_v14 = vpop.eup %2316  ;;  %v1186_v59 = vpop.xlane.xlu1 %1185  ;;  %v1352_v50 = vsel %vm869_vm1, %v2315_v42, 0.0  ;;  %2326 = vpow2.f32 %v1282_v40  ;;  %v1235_v52 = vsub.f32 %v2918_v1, %v1195_v54  ;;  %1344 = vadd.xlane.f32.xlu0 %v1343_v47 }
 0x3dd   : > { %v1232_v57 = vsub.f32 %v2912_v53, %v1186_v59  ;;  %2328 = vpow2.f32 %v1292_v12  ;;  %1353 = vadd.xlane.f32.xlu1 %v1352_v50  ;;  %v1409_v43 = vpack.c.bf16 %v2317_v14, %v2313_v48  ;;  %v1361_v9 = vsel %vm869_vm1, %v2317_v14, 0.0 }
 0x3de   : > { %v2319_v62 = vpop.eup %2318  ;;  %v1294_v7 = vmul.f32 1.442695, %v1235_v52 }
 0x3df   : > { %v1288_v34 = vmul.f32 1.442695, %v1232_v57  ;;  %v2321_v13 = vpop.eup %2320  ;;  %v1189_v61 = vpop.xlane.xlu0 %1188  ;;  %v1408_v19 = vpack.c.bf16 %v2319_v62, %v2315_v42 }
 0x3e0   : > { %v1233_v24 = vsub.f32 %v2920_v4, %v1189_v61  ;;  %v1370_v49 = vsel %vm869_vm1, %v2321_v13, 0.0  ;;  %v1198_v53 = vpop.xlane.xlu1 %1197  ;;  %1362 = vadd.xlane.f32.xlu0 %v1361_v9  ;;  %v1355_v4 = vsel %vm869_vm1, %v2319_v62, 0.0 }
 0x3e1   : > { %2330 = vpow2.f32 %v1288_v34  ;;  %1371 = vadd.xlane.f32.xlu1 %v1370_v49  ;;  %v1236_v1 = vsub.f32 %v2928_v51, %v1198_v53  ;;  %2223 = vmatprep.mubr.msk.bf16.mxu0 %vm869_vm1, %v1408_v19 }
 0x3e2   : > { %2332 = vpow2.f32 %v1294_v7  ;;  %v1290_v0 = vmul.f32 1.442695, %v1233_v24  ;;  %2224 = vmatmul.mubr.msk.bf16.gmra.mrb[48].mxu0 %vm869_vm1, %v1409_v43 }
 0x3e3   : > { %v2323_v25 = vpop.eup %2322  ;;  %v1296_v36 = vmul.f32 1.442695, %v1236_v1  ;;  %v1201_v20 = vpop.xlane.xlu0 %1200 }
 0x3e4   : > { %v2325_v2 = vpop.eup %2324  ;;  %v1364_v31 = vsel %vm869_vm1, %v2323_v25, 0.0  ;;  %2334 = vpow2.f32 %v1290_v0  ;;  %v1237_v37 = vsub.f32 %v2936_v44, %v1201_v20  ;;  %v1204_v35 = vpop.xlane.xlu1 %1203  ;;  %1356 = vadd.xlane.f32.xlu0 %v1355_v4 }
 0x3e5   : > { %v1411_v56 = vpack.c.bf16 %v2325_v2, %v2321_v13  ;;  %2336 = vpow2.f32 %v1296_v36  ;;  %1365 = vadd.xlane.f32.xlu1 %v1364_v31  ;;  %v1238_v51 = vsub.f32 %v2926_v41, %v1204_v35  ;;  %v1373_v63 = vsel %vm869_vm1, %v2325_v2, 0.0 }
 0x3e6   : > { %v2327_v11 = vpop.eup %2326  ;;  %v1298_v45 = vmul.f32 1.442695, %v1237_v37 }
 0x3e7   : > { %v2329_v48 = vpop.eup %2328  ;;  %v1300_v55 = vmul.f32 1.442695, %v1238_v51  ;;  %v1207_v60 = vpop.xlane.xlu0 %1206  ;;  %v1410_v3 = vpack.c.bf16 %v2327_v11, %v2323_v25  ;;  %v1367_v40 = vsel %vm869_vm1, %v2327_v11, 0.0  ;;  %v3028_v11 = vstv %s1625_s19 }
 0x3e8   : > { %2338 = vpow2.f32 %v1298_v45  ;;  %v1239_v10 = vsub.f32 %v2932_v58, %v1207_v60  ;;  %v1382_v44 = vsel %vm869_vm1, %v2329_v48, 0.0  ;;  %1374 = vadd.xlane.f32.xlu0 %v1373_v63 }
 0x3e9   : > { %2340 = vpow2.f32 %v1300_v55  ;;  %1383 = vadd.xlane.f32.xlu1 %v1382_v44  ;;  %2227 = vmatprep.mubr.msk.bf16.mxu0 %vm869_vm1, %v1410_v3 }
 0x3ea   : > { %v1302_v41 = vmul.f32 1.442695, %v1239_v10  ;;  %2228 = vmatmul.mubr.msk.bf16.gmra.mrb[52].mxu0 %vm869_vm1, %v1411_v56 }
 0x3eb   : > { %v2331_v32 = vpop.eup %2330 }
 0x3ec   : > { %v2333_v46 = vpop.eup %2332  ;;  %v1376_v42 = vsel %vm869_vm1, %v2331_v32, 0.0  ;;  %2342 = vpow2.f32 %v1302_v41  ;;  %1368 = vadd.xlane.f32.xlu0 %v1367_v40 }
 0x3ed   : > { %v1413_v12 = vpack.c.bf16 %v2333_v46, %v2329_v48  ;;  %1377 = vadd.xlane.f32.xlu1 %v1376_v42  ;;  %v1385_v59 = vsel %vm869_vm1, %v2333_v46, 0.0 }
 0x3ee   : > { %v2335_v58 = vpop.eup %2334 }
 0x3ef   : > { %v2337_v14 = vpop.eup %2336  ;;  %v1412_v54 = vpack.c.bf16 %v2335_v58, %v2331_v32  ;;  %v1379_v52 = vsel %vm869_vm1, %v2335_v58, 0.0 }
 0x3f0   : > { %1386 = vadd.xlane.f32.xlu0 %v1385_v59  ;;  %v1388_v50 = vsel %vm869_vm1, %v2337_v14, 0.0 }
 0x3f1   : > { %2231 = vmatprep.mubr.msk.bf16.mxu0 %vm869_vm1, %v1412_v54  ;;  %1389 = vadd.xlane.f32.xlu1 %v1388_v50 }
 0x3f2   : > { %v2339_v47 = vpop.eup %2338  ;;  %2232 = vmatmul.mubr.msk.bf16.gmra.mrb[56].mxu0 %vm869_vm1, %v1413_v12 }
 0x3f3   : > { %v2341_v57 = vpop.eup %2340  ;;  %v1414_v43 = vpack.c.bf16 %v2339_v47, %v2337_v14  ;;  %v1391_v13 = vsel %vm869_vm1, %v2339_v47, 0.0  ;;  %v2408_v14 = vld [vmem:[%s2489_s30 + $0x10] sm:$0xff]  ;;  %v2409_v47 = vld [vmem:[%s2489_s30] sm:$0xff] }
 0x3f4   : > { %1380 = vadd.xlane.f32.xlu0 %v1379_v52  ;;  %v1394_v62 = vsel %vm869_vm1, %v2341_v57, 0.0 }
 0x3f5   : > { %1395 = vadd.xlane.f32.xlu1 %v1394_v62  ;;  %2235 = vmatprep.mubr.msk.bf16.mxu1 %vm869_vm1, %v1414_v43 }
 0x3f6   : > { %v2343_v34 = vpop.eup %2342 }
 0x3f7   : > { %v1415_v7 = vpack.c.bf16 %v2343_v34, %v2341_v57  ;;  %v1397_v61 = vsel %vm869_vm1, %v2343_v34, 0.0 }
 0x3f8   : > { %1392 = vadd.xlane.f32.xlu0 %v1391_v13 }
 0x3f9   : > { %2236 = vmatmul.mubr.msk.bf16.vlgmr.msra.gmra.mrb[56].mxu1 %vm869_vm1, %v1415_v7 }
 0x3fc   : > { %1398 = vadd.xlane.f32.xlu0 %v1397_v61 }
 0x445   : > { %v1312_v9 = vpop.xlane.xlu1 %1311 }
 0x446   : > { %2344 = vrcp.f32 %v1312_v9 }
 0x449   : > { %v1306_v24 = vpop.xlane.xlu1 %1305 }
 0x44a   : > { %2346 = vrcp.f32 %v1306_v24 }
 0x44d   : > { %v1315_v19 = vpop.xlane.xlu0 %1314 }
 0x44e   : > { %v1324_v53 = vpop.xlane.xlu1 %1323  ;;  %2348 = vrcp.f32 %v1315_v19 }
 0x450   : > { %v2345_v51 = vpop.eup %2344 }
 0x451   : > { %v1309_v49 = vpop.xlane.xlu0 %1308  ;;  %v1661_v3 = vmul.f32 %v2345_v51, %v3028_v11 }
 0x452   : > { %v1318_v25 = vpop.xlane.xlu1 %1317  ;;  %2350 = vrcp.f32 %v1309_v49 }
 0x453   : > { %2352 = vrcp.f32 %v1324_v53 }
 0x454   : > { %2354 = vrcp.f32 %v1318_v25  ;;  %v2347_v45 = vpop.eup %2346 }
 0x455   : > { %v1327_v1 = vpop.xlane.xlu0 %1326  ;;  %v1659_v44 = vmul.f32 %v2347_v45, %v3028_v11 }
 0x456   : > { %v1336_v2 = vpop.xlane.xlu1 %1335  ;;  %2356 = vrcp.f32 %v1327_v1 }
 0x458   : > { %v2349_v55 = vpop.eup %2348 }
 0x459   : > { %v1321_v0 = vpop.xlane.xlu0 %1320  ;;  %v1662_v46 = vmul.f32 %v2349_v55, %v3028_v11 }
 0x45a   : > { %v1330_v20 = vpop.xlane.xlu1 %1329  ;;  %2358 = vrcp.f32 %v1321_v0 }
 0x45b   : > { %2360 = vrcp.f32 %v1336_v2 }
 0x45c   : > { %v2351_v60 = vpop.eup %2350  ;;  %2362 = vrcp.f32 %v1330_v20 }
 0x45d   : > { %v1339_v36 = vpop.xlane.xlu0 %1338  ;;  %v1660_v12 = vmul.f32 %v2351_v60, %v3028_v11  ;;  %v2353_v43 = vpop.eup %2352 }
 0x45e   : > { %v1348_v4 = vpop.xlane.xlu1 %1347  ;;  %2364 = vrcp.f32 %v1339_v36  ;;  %v2355_v7 = vpop.eup %2354  ;;  %v1665_v19 = vmul.f32 %v2353_v43, %v3028_v11 }
 0x45f   : > { %v1663_v53 = vmul.f32 %v2355_v7, %v3028_v11 }
 0x460   : > { %v2357_v61 = vpop.eup %2356 }
 0x461   : > { %v1333_v31 = vpop.xlane.xlu0 %1332 }
 0x462   : > { %v1342_v35 = vpop.xlane.xlu1 %1341  ;;  %2366 = vrcp.f32 %v1333_v31 }
 0x463   : > { %2368 = vrcp.f32 %v1348_v4 }
 0x464   : > { %v2359_v9 = vpop.eup %2358  ;;  %2370 = vrcp.f32 %v1342_v35 }
 0x465   : > { %v3024_v37 = vpop.xlane.xlu0 %1350  ;;  %v1664_v36 = vmul.f32 %v2359_v9, %v3028_v11  ;;  %v2361_v45 = vpop.eup %2360 }
 0x466   : > { %v3030_v48 = vpop.xlane.xlu1 %1359  ;;  %2372 = vrcp.f32 %v3024_v37  ;;  %v2363_v60 = vpop.eup %2362 }
 0x469   : > { %v3026_v56 = vpop.xlane.xlu0 %1344 }
 0x46a   : > { %v3045_v58 = vpop.xlane.xlu1 %1353  ;;  %2374 = vrcp.f32 %v3026_v56 }
 0x46b   : > { %2376 = vrcp.f32 %v3030_v48 }
 0x46c   : > { %2378 = vrcp.f32 %v3045_v58 }
 0x46d   : > { %v3032_v63 = vpop.xlane.xlu0 %1362 }
 0x46e   : > { %v3056_v24 = vpop.xlane.xlu1 %1371  ;;  %2380 = vrcp.f32 %v3032_v63 }
 0x471   : > { %v1357_v62 = vpop.xlane.xlu0 %1356 }
 0x472   : > { %v1366_v35 = vpop.xlane.xlu1 %1365  ;;  %2382 = vrcp.f32 %v1357_v62 }
 0x473   : > { %2384 = vrcp.f32 %v3056_v24 }
 0x474   : > { %2386 = vrcp.f32 %v1366_v35 }
 0x475   : > { %v3060_v0 = vpop.xlane.xlu0 %1374 }
 0x476   : > { %2388 = vrcp.f32 %v3060_v0 }
 0x494   : > { %v2209_v10 = vpop.f32.mrb[32].mxu0 }
 0x495   : > { %v1693_v32 = vmul.f32 %v2209_v10, %v1661_v3  ;;  %v1498_v41 = vpop.f32.mrb[33].mxu0  ;;  %v2365_v10 = vpop.eup %2364 }
 0x496   : > { %v1691_v42 = vmul.f32 %v1659_v44, %v1498_v41  ;;  %v2210_v40 = vpop.f32.mrb[34].mxu0  ;;  %v2367_v44 = vpop.eup %2366  ;;  %v1670_v56 = vmul.f32 %v2365_v10, %v3028_v11 }
 0x497   : > { %v1725_v59 = vadd.f32 %v2408_v14, %v1693_v32  ;;  %v1694_v54 = vmul.f32 %v2210_v40, %v1662_v46  ;;  %v1501_v50 = vpop.f32.mrb[35].mxu0  ;;  %v1669_v32 = vmul.f32 %v2361_v45, %v3028_v11  ;;  %v1369_v41 = vpop.xlane.xlu0 %1368 }
 0x498   : > { %v1723_v57 = vadd.f32 %v2409_v47, %v1691_v42  ;;  %v1692_v52 = vmul.f32 %v1660_v12, %v1501_v50  ;;  %v1384_v50 = vpop.xlane.xlu1 %1383  ;;  %2390 = vrcp.f32 %v1369_v41 }
 0x499   : > { %1757 = vst [vmem:[%s3042_s4 + $0x10] sm:$0xff] %v1725_v59  ;;  %v1726_v34 = vadd.f32 %v1694_v54, %v2559_v15  ;;  %v1666_v15 = vmul.f32 %v2357_v61, %v3028_v11  ;;  %v2369_v54 = vpop.eup %2368  ;;  %2392 = vrcp.f32 %v1384_v50 }
 0x49a   : > { %1755 = vst [vmem:[%s3042_s4] sm:$0xff] %v1723_v57  ;;  %v1724_v13 = vadd.f32 %v1692_v52, %v2502_v5  ;;  %v2371_v57 = vpop.eup %2370  ;;  %v1673_v7 = vmul.f32 %v2369_v54, %v3028_v11 }
 0x49b   : > { %1758 = vst [vmem:[%s3042_s4 + $0x18] sm:$0xff] %v1726_v34  ;;  %v2373_v43 = vpop.eup %2372  ;;  %v1387_v58 = vpop.xlane.xlu0 %1386 }
 0x49c   : > { %1756 = vst [vmem:[%s3042_s4 + $0x8] sm:$0xff] %v1724_v13  ;;  %v2375_v34 = vpop.eup %2374  ;;  %v1671_v13 = vmul.f32 %v2371_v57, %v3028_v11  ;;  %v1674_v62 = vmul.f32 %v2373_v43, %v3028_v11 }
 0x49d   : > { %v2213_v49 = vpop.f32.mrb[36].mxu0 }
 0x49e   : > { %v1697_v1 = vmul.f32 %v2213_v49, %v1665_v19  ;;  %v1514_v25 = vpop.f32.mrb[37].mxu0 }
 0x49f   : > { %v1695_v5 = vmul.f32 %v1663_v53, %v1514_v25  ;;  %v2214_v2 = vpop.f32.mrb[38].mxu0  ;;  %v2377_v25 = vpop.eup %2376 }
 0x4a0   : > { %v1729_v20 = vadd.f32 %v1697_v1, %v2603_v26  ;;  %v1698_v31 = vmul.f32 %v2214_v2, %v1666_v15  ;;  %v1517_v51 = vpop.f32.mrb[39].mxu0  ;;  %v1381_v15 = vpop.xlane.xlu0 %1380 }
 0x4a1   : > { %v1727_v55 = vadd.f32 %v1695_v5, %v2570_v18  ;;  %v1696_v4 = vmul.f32 %v1664_v36, %v1517_v51  ;;  %v1667_v18 = vmul.f32 %v2363_v60, %v3028_v11  ;;  %v2379_v2 = vpop.eup %2378  ;;  %v1677_v51 = vmul.f32 %v2377_v25, %v3028_v11 }
 0x4a2   : > { %1761 = vst [vmem:[%s3042_s4 + $0x30] sm:$0xff] %v1729_v20  ;;  %v1730_v3 = vadd.f32 %v1698_v31, %v2608_v27  ;;  %v2381_v20 = vpop.eup %2380 }
 0x4a3   : > { %1759 = vst [vmem:[%s3042_s4 + $0x20] sm:$0xff] %v1727_v55  ;;  %v1728_v26 = vadd.f32 %v1696_v4, %v2580_v21  ;;  %v1668_v21 = vmul.f32 %v2367_v44, %v3028_v11  ;;  %v2383_v31 = vpop.eup %2382  ;;  %v1675_v55 = vmul.f32 %v2379_v2, %v3028_v11  ;;  %v1678_v60 = vmul.f32 %v2381_v20, %v3028_v11  ;;  %v3187_v2 = vld [vmem:[#allocation5_spill] sm:$0xff] }
 0x4a4   : > { %1762 = vst [vmem:[%s3042_s4 + $0x38] sm:$0xff] %v1730_v3 }
 0x4a5   : > { %1760 = vst [vmem:[%s3042_s4 + $0x28] sm:$0xff] %v1728_v26  ;;  %v2217_v37 = vpop.f32.mrb[40].mxu0 }
 0x4a6   : > { %v1701_v46 = vmul.f32 %v2217_v37, %v1669_v32  ;;  %v1530_v42 = vpop.f32.mrb[41].mxu0  ;;  %v2385_v32 = vpop.eup %2384 }
 0x4a7   : > { %v1699_v27 = vmul.f32 %v1667_v18, %v1530_v42  ;;  %v2218_v40 = vpop.f32.mrb[42].mxu0  ;;  %v2387_v18 = vpop.eup %2386 }
 0x4a8   : > { %v1733_v12 = vadd.f32 %v1701_v46, %v2562_v16  ;;  %v1702_v14 = vmul.f32 %v2218_v40, %v1670_v56  ;;  %v1533_v59 = vpop.f32.mrb[43].mxu0  ;;  %v2389_v42 = vpop.eup %2388  ;;  %v1681_v40 = vmul.f32 %v2385_v32, %v3028_v11 }
 0x4a9   : > { %v1731_v47 = vadd.f32 %v1699_v27, %v2505_v6  ;;  %v1700_v48 = vmul.f32 %v1668_v21, %v1533_v59 }
 0x4aa   : > { %1765 = vst [vmem:[%s3042_s4 + $0x50] sm:$0xff] %v1733_v12  ;;  %v1734_v52 = vadd.f32 %v1702_v14, %v2565_v17  ;;  %v1378_v17 = vpop.xlane.xlu1 %1377 }
 0x4ab   : > { %1763 = vst [vmem:[%s3042_s4 + $0x40] sm:$0xff] %v1731_v47  ;;  %v1732_v16 = vadd.f32 %v1700_v48, %v2511_v8  ;;  %v1672_v8 = vmul.f32 %v2375_v34, %v3028_v11  ;;  %2394 = vrcp.f32 %v1378_v17  ;;  %v3183_v47 = vld [vmem:[#allocation11_spill] sm:$0xff] }
 0x4ac   : > { %1766 = vst [vmem:[%s3042_s4 + $0x58] sm:$0xff] %v1734_v52  ;;  %2396 = vrcp.f32 %v1387_v58  ;;  %v3184_v58 = vld [vmem:[#allocation7_spill] sm:$0xff] }
 0x4ad   : > { %1764 = vst [vmem:[%s3042_s4 + $0x48] sm:$0xff] %v1732_v16  ;;  %v2221_v63 = vpop.f32.mrb[44].mxu0  ;;  %2398 = vrcp.f32 %v1381_v15 }
 0x4ae   : > { %v1705_v6 = vmul.f32 %v2221_v63, %v1673_v7  ;;  %v1546_v61 = vpop.f32.mrb[45].mxu0  ;;  %v1390_v45 = vpop.xlane.xlu1 %1389  ;;  %v3185_v63 = vld [vmem:[#allocation12_spill] sm:$0xff] }
 0x4af   : > { %v1703_v9 = vmul.f32 %v1671_v13, %v1546_v61  ;;  %v2222_v19 = vpop.f32.mrb[46].mxu0  ;;  %v3186_v61 = vld [vmem:[#allocation8_spill] sm:$0xff] }
 0x4b0   : > { %v1737_v49 = vadd.f32 %v1705_v6, %v2611_v28  ;;  %v1706_v53 = vmul.f32 %v2222_v19, %v1674_v62  ;;  %v1549_v1 = vpop.f32.mrb[47].mxu0 }
 0x4b1   : > { %v1735_v24 = vadd.f32 %v1703_v9, %v2583_v22  ;;  %v1704_v5 = vmul.f32 %v1672_v8, %v1549_v1 }
 0x4b2   : > { %1769 = vst [vmem:[%s3042_s4 + $0x70] sm:$0xff] %v1737_v49  ;;  %v1738_v36 = vadd.f32 %v1706_v53, %v2614_v29  ;;  %v1393_v29 = vpop.xlane.xlu0 %1392  ;;  %v1396_v56 = vpop.xlane.xlu1 %1395 }
 0x4b3   : > { %1767 = vst [vmem:[%s3042_s4 + $0x60] sm:$0xff] %v1735_v24  ;;  %v1736_v28 = vadd.f32 %v1704_v5, %v2586_v23  ;;  %v1676_v23 = vmul.f32 %v2383_v31, %v3028_v11  ;;  %2400 = vrcp.f32 %v1396_v56 }
 0x4b4   : > { %1770 = vst [vmem:[%s3042_s4 + $0x78] sm:$0xff] %v1738_v36  ;;  %2402 = vrcp.f32 %v1390_v45 }
 0x4b5   : > { %1768 = vst [vmem:[%s3042_s4 + $0x68] sm:$0xff] %v1736_v28  ;;  %v2225_v0 = vpop.f32.mrb[48].mxu0 }
 0x4b6   : > { %v1709_v22 = vmul.f32 %v2225_v0, %v1677_v51  ;;  %v1562_v4 = vpop.f32.mrb[49].mxu0  ;;  %v1399_v21 = vpop.xlane.xlu0 %1398  ;;  %v3188_v51 = vld [vmem:[#allocation3_spill] sm:$0xff] }
 0x4b7   : > { %v1707_v3 = vmul.f32 %v1675_v55, %v1562_v4  ;;  %v2226_v10 = vpop.f32.mrb[50].mxu0  ;;  %2404 = vrcp.f32 %v1399_v21 }
 0x4b8   : > { %v1741_v35 = vadd.f32 %v1709_v22, %v2673_v38  ;;  %v1710_v26 = vmul.f32 %v2226_v10, %v1678_v60  ;;  %v1565_v44 = vpop.f32.mrb[51].mxu0  ;;  %v2391_v38 = vpop.eup %2390  ;;  %2406 = vrcp.f32 %v1393_v29  ;;  %v3189_v22 = vld [vmem:[#allocation6_spill] sm:$0xff]  ;;  %v3190_v29 = vld [vmem:[#allocation4_spill] sm:$0xff] }
 0x4b9   : > { %v1739_v41 = vadd.f32 %v1707_v3, %v2621_v30  ;;  %v1708_v37 = vmul.f32 %v1676_v23, %v1565_v44  ;;  %v1679_v30 = vmul.f32 %v2387_v18, %v3028_v11  ;;  %v2393_v43 = vpop.eup %2392 }
 0x4ba   : > { %1773 = vst [vmem:[%s3042_s4 + $0x90] sm:$0xff] %v1741_v35  ;;  %v1742_v46 = vadd.f32 %v1710_v26, %v2676_v39  ;;  %v1682_v39 = vmul.f32 %v2389_v42, %v3028_v11  ;;  %v2395_v7 = vpop.eup %2394  ;;  %v1685_v9 = vmul.f32 %v2393_v43, %v3028_v11 }
 0x4bb   : > { %1771 = vst [vmem:[%s3042_s4 + $0x80] sm:$0xff] %v1739_v41  ;;  %v1740_v27 = vadd.f32 %v1708_v37, %v2632_v33  ;;  %v1680_v33 = vmul.f32 %v2391_v38, %v3028_v11  ;;  %v2397_v6 = vpop.eup %2396  ;;  %v1683_v8 = vmul.f32 %v2395_v7, %v3028_v11  ;;  %v3192_v38 = vld [vmem:[#allocation9_spill] sm:$0xff] }
 0x4bc   : > { %1774 = vst [vmem:[%s3042_s4 + $0x98] sm:$0xff] %v1742_v46  ;;  %v2399_v17 = vpop.eup %2398  ;;  %v1686_v1 = vmul.f32 %v2397_v6, %v3028_v11  ;;  %v3191_v46 = vld [vmem:[#allocation13_spill] sm:$0xff] }
 0x4bd   : > { %1772 = vst [vmem:[%s3042_s4 + $0x88] sm:$0xff] %v1740_v27  ;;  %v2229_v12 = vpop.f32.mrb[52].mxu0  ;;  %v1684_v24 = vmul.f32 %v2399_v17, %v3028_v11  ;;  %v2401_v5 = vpop.eup %2400 }
 0x4be   : > { %v1713_v14 = vmul.f32 %v2229_v12, %v1681_v40  ;;  %v1578_v59 = vpop.f32.mrb[53].mxu0  ;;  %v2403_v31 = vpop.eup %2402  ;;  %v1689_v10 = vmul.f32 %v2401_v5, %v3028_v11  ;;  %v3193_v12 = vld [vmem:[#allocation14_spill] sm:$0xff] }
 0x4bf   : > { %v1711_v54 = vmul.f32 %v1679_v30, %v1578_v59  ;;  %v2230_v50 = vpop.f32.mrb[54].mxu0  ;;  %v1687_v35 = vmul.f32 %v2403_v31, %v3028_v11 }
 0x4c0   : > { %v1745_v48 = vadd.f32 %v1713_v14, %v3183_v47  ;;  %v1714_v57 = vmul.f32 %v2230_v50, %v1682_v39  ;;  %v1581_v52 = vpop.f32.mrb[55].mxu0  ;;  %v3194_v14 = vld [vmem:[#allocation10_spill] sm:$0xff] }
 0x4c1   : > { %v1743_v16 = vadd.f32 %v1711_v54, %v3184_v58  ;;  %v1712_v34 = vmul.f32 %v1680_v33, %v1581_v52  ;;  %v2405_v55 = vpop.eup %2404 }
 0x4c2   : > { %1777 = vst [vmem:[%s3042_s4 + $0xb0] sm:$0xff] %v1745_v48  ;;  %v1746_v13 = vadd.f32 %v1714_v57, %v3185_v63  ;;  %v2407_v60 = vpop.eup %2406  ;;  %v1690_v32 = vmul.f32 %v2405_v55, %v3028_v11 }
 0x4c3   : > { %1775 = vst [vmem:[%s3042_s4 + $0xa0] sm:$0xff] %v1743_v16  ;;  %v1744_v62 = vadd.f32 %v1712_v34, %v3186_v61  ;;  %v1688_v18 = vmul.f32 %v2407_v60, %v3028_v11 }
 0x4c4   : > { %1778 = vst [vmem:[%s3042_s4 + $0xb8] sm:$0xff] %v1746_v13 }
 0x4c5   : > { %1776 = vst [vmem:[%s3042_s4 + $0xa8] sm:$0xff] %v1744_v62  ;;  %v2233_v19 = vpop.f32.mrb[56].mxu0 }
 0x4c6   : > { %v1717_v49 = vmul.f32 %v2233_v19, %v1685_v9  ;;  %v1594_v53 = vpop.f32.mrb[57].mxu0 }
 0x4c7   : > { %v1715_v25 = vmul.f32 %v1683_v8, %v1594_v53  ;;  %v2234_v15 = vpop.f32.mrb[58].mxu0 }
 0x4c8   : > { %v1749_v36 = vadd.f32 %v1717_v49, %v3187_v2  ;;  %v1718_v20 = vmul.f32 %v2234_v15, %v1686_v1  ;;  %v1597_v28 = vpop.f32.mrb[59].mxu0 }
 0x4c9   : > { %v1747_v45 = vadd.f32 %v1715_v25, %v3188_v51  ;;  %v1716_v0 = vmul.f32 %v1684_v24, %v1597_v28 }
 0x4ca   : > { %1781 = vst [vmem:[%s3042_s4 + $0xd0] sm:$0xff] %v1749_v36  ;;  %v1750_v4 = vadd.f32 %v1718_v20, %v3189_v22 }
 0x4cb   : > { %1779 = vst [vmem:[%s3042_s4 + $0xc0] sm:$0xff] %v1747_v45  ;;  %v1748_v3 = vadd.f32 %v1716_v0, %v3190_v29 }
 0x4cc   : > { %1782 = vst [vmem:[%s3042_s4 + $0xd8] sm:$0xff] %v1750_v4  ;;  %v2237_v23 = vpop.f32.mrb[56].mxu1 }
 0x4cd   : > { %1780 = vst [vmem:[%s3042_s4 + $0xc8] sm:$0xff] %v1748_v3  ;;  %v1721_v26 = vmul.f32 %v2237_v23, %v1689_v10  ;;  %v1610_v44 = vpop.f32.mrb[57].mxu1 }
 0x4ce   : > { %v1719_v41 = vmul.f32 %v1687_v35, %v1610_v44  ;;  %v2238_v37 = vpop.f32.mrb[58].mxu1 }
 0x4cf   : > { %v1753_v42 = vadd.f32 %v1721_v26, %v3191_v46  ;;  %v1722_v56 = vmul.f32 %v2238_v37, %v1690_v32  ;;  %v1613_v27 = vpop.f32.mrb[59].mxu1 }
 0x4d0   : > { %v1751_v40 = vadd.f32 %v1719_v41, %v3192_v38  ;;  %v1720_v21 = vmul.f32 %v1688_v18, %v1613_v27 }
 0x4d1   : > { %1785 = vst [vmem:[%s3042_s4 + $0xf0] sm:$0xff] %v1753_v42  ;;  %v1754_v30 = vadd.f32 %v1722_v56, %v3193_v12 }
 0x4d2   : > { %1783 = vst [vmem:[%s3042_s4 + $0xe0] sm:$0xff] %v1751_v40  ;;  %v1752_v59 = vadd.f32 %v1720_v21, %v3194_v14 }
 0x4d3   : > { %1786 = vst [vmem:[%s3042_s4 + $0xf8] sm:$0xff] %v1754_v30 }
 0x4d4   : > { %1784 = vst [vmem:[%s3042_s4 + $0xe8] sm:$0xff] %v1752_v59 }
 0x4d5 PF: > { %s16_s20 = sadd.s32 1, %s2416_s20  }
 0x4d6   : > { %p13_p4 = scmp.ge.s32.totalorder %s16_s20, 4  }
 0x4d8   :  { %15 = sbr.rel (!%p13_p4) target bundleno = 2 (0x2), region = 70 }

</bundles_post_ra>
